<compile_context>
chip_gen: v7x
topology: tpu7x:2x2x1
jax: 0.10.0
libtpu: 0.0.40
codegen_flags: <defaults>
</compile_context>

<pallas_src>
import numpy as np
import jax
import jax.numpy as jnp
from jax.experimental import pallas as pl
from jax.experimental.pallas import tpu as pltpu

HIDDEN_SIZE = 10
INPUT_SIZE = 8
NUM_CLASSES = 1
NUM_LAYERS = 1          # single-layer LSTM (matches the reference module config)
SEQ_LEN = 8
BATCH = 8               # fills all 8 f32 vreg sublanes (perf review item #1)
FC1_DIM = 512

GATE_SLOT = 128                   # one 128-lane vreg slot per gate
G4 = 4 * GATE_SLOT                # padded 4H width
HP = 128                          # padded hidden width (lane dim of h / c)


def _lstm_mlp_kernel(x_ref, w_ih_ref, w_hh_ref, b_ref,
                     fc1_w_ref, fc1_b_ref, fc_w_ref, fc_b_ref,
                     out_ref):
    """Whole-network kernel: LSTM recurrence (over T) + ReLU-MLP head.

    x_ref    : (T, BB, I)  f32  time-major batch chunk
    w_ih_ref : (I, 512)    f32  gate k in lanes [k*128, k*128+H)
    w_hh_ref : (128, 512)  f32  rows >= H zero
    b_ref    : (1, 512)    f32  (b_ih + b_hh), zero in padded lanes
    fc1_*    : (128, 512), (1, 512)
    fc_*     : (1, 512), (1, 1)
    out_ref  : (BB, 1)
    """
    T, BB, _ = x_ref.shape
    _, G4k = w_hh_ref.shape
    GS = G4k // 4                                          # 128

    w_ih = w_ih_ref[...]                                   # (I, 512)
    w_hh = w_hh_ref[...]                                   # (128, 512)
    b = b_ref[...]                                         # (1, 512)

    # ---- Hoisted input projection: T small sublane-aligned matmuls, no reshape.
    # Each x_ref[t] is a contiguous (BB, I) slab; all T matmuls are independent
    # of the recurrence and pipeline ahead of it.
    xp = [jnp.dot(x_ref[t], w_ih, preferred_element_type=jnp.float32) + b
          for t in range(T)]                               # T x (BB, 512)

    h = jnp.zeros((BB, HP), jnp.float32)
    c = jnp.zeros((BB, HP), jnp.float32)

    # T is small and static -> fully unrolled recurrence.
    # Per step: 1 fused MXU push, 3 sigmoid vregs + 2 tanh vregs on the EUP,
    # and only vreg-aligned slices (no XLU work on the serial chain).
    for t in range(T):
        gates = xp[t] + jnp.dot(h, w_hh,
                                preferred_element_type=jnp.float32)   # (BB, 512)
        i_g = jax.nn.sigmoid(gates[:, 0 * GS:1 * GS])      # lanes 0..127
        f_g = jax.nn.sigmoid(gates[:, 1 * GS:2 * GS])      # lanes 128..255
        g_g = jnp.tanh(gates[:, 2 * GS:3 * GS])            # lanes 256..383
        o_g = jax.nn.sigmoid(gates[:, 3 * GS:4 * GS])      # lanes 384..511
        # Padded lanes (>= H): g == tanh(0) == 0 and c starts at 0, so padded
        # lanes of c and h remain exactly 0 for all steps.
        c = f_g * c + i_g * g_g
        h = o_g * jnp.tanh(c)

    # ---- Head: relu(hn) -> fc_1 -> relu -> fc ----
    hn = jnp.maximum(h, 0.0)                               # (BB, 128), pad lanes 0
    y = jnp.dot(hn, fc1_w_ref[...],
                preferred_element_type=jnp.float32) + fc1_b_ref[...]   # (BB, 512)
    y = jnp.maximum(y, 0.0)
    # Final Linear(512, 1) as VPU multiply + lane reduction (no 1-lane MXU dot).
    out = jnp.sum(y * fc_w_ref[...], axis=-1, keepdims=True) + fc_b_ref[...]
    out_ref[...] = out.astype(out_ref.dtype)


def lstm_forward(x, params, *, batch_block=8):
    """x: (B, T, I) batch-first float32, like the PyTorch module."""
    B, T, I = x.shape
    bb = batch_block
    b_pad = ((B + bb - 1) // bb) * bb
    if b_pad != B:
        x = jnp.pad(x, ((0, b_pad - B), (0, 0), (0, 0)))
    # Time-major so every timestep is a contiguous, sublane-aligned (bb, I) slab
    # inside the kernel (avoids the in-kernel reshape / sublane repack).
    x_tm = jnp.transpose(x, (1, 0, 2))                     # (T, b_pad, I)

    grid = (b_pad // bb,)

    in_specs = [
        pl.BlockSpec((T, bb, I), lambda i: (0, i, 0)),             # x (time-major)
        pl.BlockSpec((I, G4), lambda i: (0, 0)),                   # w_ih
        pl.BlockSpec((HP, G4), lambda i: (0, 0)),                  # w_hh
        pl.BlockSpec((1, G4), lambda i: (0, 0)),                   # b
        pl.BlockSpec((HP, FC1_DIM), lambda i: (0, 0)),             # fc1_w
        pl.BlockSpec((1, FC1_DIM), lambda i: (0, 0)),              # fc1_b
        pl.BlockSpec((1, FC1_DIM), lambda i: (0, 0)),              # fc_w
        pl.BlockSpec((1, NUM_CLASSES), lambda i: (0, 0)),          # fc_b
    ]
    out_specs = pl.BlockSpec((bb, NUM_CLASSES), lambda i: (i, 0))

    out = pl.pallas_call(
        _lstm_mlp_kernel,
        out_shape=jax.ShapeDtypeStruct((b_pad, NUM_CLASSES), jnp.float32),
        grid=grid,
        in_specs=in_specs,
        out_specs=out_specs,
        # Batch axis is embarrassingly parallel: shards across v7x's 2 TCs once
        # the batch grows; grid == 1 at the demo size so no extra step overhead.
        compiler_params=pltpu.CompilerParams(
            dimension_semantics=("parallel",)),
    )(x_tm,
      params["w_ih"], params["w_hh"], params["b"],
      params["fc1_w"], params["fc1_b"], params["fc_w"], params["fc_b"])
    return out[:B]


def init_base_params(key):
    """Deterministic synthetic parameters in the standard (unpadded) stacked
    right-multiply layout (gate order i|f|g|o), PyTorch-style uniform init."""
    ks = jax.random.split(key, 8)
    k_lstm = 1.0 / np.sqrt(HIDDEN_SIZE)
    k_fc1 = 1.0 / np.sqrt(HIDDEN_SIZE)
    k_fc = 1.0 / np.sqrt(FC1_DIM)

    def u(k, shape, bound):
        return jax.random.uniform(k, shape, jnp.float32, -bound, bound)

    H4 = 4 * HIDDEN_SIZE
    return {
        "w_ih": u(ks[0], (INPUT_SIZE, H4), k_lstm),
        "w_hh": u(ks[1], (HIDDEN_SIZE, H4), k_lstm),
        "b":    u(ks[2], (1, H4), k_lstm) + u(ks[3], (1, H4), k_lstm),  # b_ih + b_hh
        "fc1_w": u(ks[4], (HIDDEN_SIZE, FC1_DIM), k_fc1),
        "fc1_b": u(ks[5], (1, FC1_DIM), k_fc1),
        "fc_w":  u(ks[6], (1, FC1_DIM), k_fc),
        "fc_b":  u(ks[7], (1, NUM_CLASSES), k_fc),
    }


def pack_params(base):
    """One-time repack into the lane-aligned kernel layout (done outside the
    kernel): each gate gets its own 128-lane slot; hidden dim padded to 128."""
    H = HIDDEN_SIZE
    w_ih = jnp.zeros((INPUT_SIZE, G4), jnp.float32)
    w_hh = jnp.zeros((HP, G4), jnp.float32)
    b = jnp.zeros((1, G4), jnp.float32)
    for k in range(4):
        w_ih = w_ih.at[:, k * GATE_SLOT:k * GATE_SLOT + H].set(
            base["w_ih"][:, k * H:(k + 1) * H])
        w_hh = w_hh.at[:H, k * GATE_SLOT:k * GATE_SLOT + H].set(
            base["w_hh"][:, k * H:(k + 1) * H])
        b = b.at[:, k * GATE_SLOT:k * GATE_SLOT + H].set(
            base["b"][:, k * H:(k + 1) * H])
    fc1_w = jnp.zeros((HP, FC1_DIM), jnp.float32).at[:H, :].set(base["fc1_w"])
    return {
        "w_ih": w_ih, "w_hh": w_hh, "b": b,
        "fc1_w": fc1_w, "fc1_b": base["fc1_b"],
        "fc_w": base["fc_w"], "fc_b": base["fc_b"],
    }


def lstm_forward_reference(x, base):
    """Pure-JAX reference with identical semantics (unpadded layout)."""
    B, T, _ = x.shape
    H = HIDDEN_SIZE
    h = jnp.zeros((B, H), jnp.float32)
    c = jnp.zeros((B, H), jnp.float32)
    for t in range(T):
        gates = x[:, t, :] @ base["w_ih"] + h @ base["w_hh"] + base["b"]
        i_g = jax.nn.sigmoid(gates[:, 0:H])
        f_g = jax.nn.sigmoid(gates[:, H:2 * H])
        g_g = jnp.tanh(gates[:, 2 * H:3 * H])
        o_g = jax.nn.sigmoid(gates[:, 3 * H:4 * H])
        c = f_g * c + i_g * g_g
        h = o_g * jnp.tanh(c)
    y = jnp.maximum(h, 0.0) @ base["fc1_w"] + base["fc1_b"]
    y = jnp.maximum(y, 0.0)
    return jnp.sum(y * base["fc_w"], axis=-1, keepdims=True) + base["fc_b"]


if __name__ == "__main__":
    key = jax.random.PRNGKey(0)
    k_x, k_p = jax.random.split(key)
    x = jax.random.normal(k_x, (BATCH, SEQ_LEN, INPUT_SIZE), jnp.float32)

    base = init_base_params(k_p)
    params = pack_params(base)

    out = lstm_forward(x, params)
    out = jax.block_until_ready(out)

    ref = jax.block_until_ready(lstm_forward_reference(x, base))
    assert out.shape == (BATCH, NUM_CLASSES)
    np.testing.assert_allclose(np.asarray(out), np.asarray(ref),
                               rtol=1e-4, atol=1e-5)

    print("KERNEL_OK")
</pallas_src>

<mosaic_0001>
module attributes {stable_mosaic.version = 11 : i64} {
  func.func @_lstm_mlp_kernel(%arg0: i32, %arg1: memref<8x8x8xf32, #tpu.memory_space<vmem>>, %arg2: memref<8x512xf32, #tpu.memory_space<vmem>>, %arg3: memref<128x512xf32, #tpu.memory_space<vmem>>, %arg4: memref<1x512xf32, #tpu.memory_space<vmem>>, %arg5: memref<128x512xf32, #tpu.memory_space<vmem>>, %arg6: memref<1x512xf32, #tpu.memory_space<vmem>>, %arg7: memref<1x512xf32, #tpu.memory_space<vmem>>, %arg8: memref<1x1xf32, #tpu.memory_space<vmem>>, %arg9: memref<8x1xf32, #tpu.memory_space<vmem>>) attributes {dimension_semantics = [#tpu.dimension_semantics<parallel>], iteration_bounds = array<i64: 1>, scalar_prefetch = 0 : i64, scratch_operands = 0 : i64, tpu.core_type = #tpu.core_type<tc>, window_params = [{transform_indices = @transform_0, window_bounds = array<i64: 8, 8, 8>}, {pipeline_mode = #tpu.pipeline_mode<synchronous>, transform_indices = @transform_1, window_bounds = array<i64: 8, 512>}, {pipeline_mode = #tpu.pipeline_mode<synchronous>, transform_indices = @transform_2, window_bounds = array<i64: 128, 512>}, {pipeline_mode = #tpu.pipeline_mode<synchronous>, transform_indices = @transform_3, window_bounds = array<i64: 1, 512>}, {pipeline_mode = #tpu.pipeline_mode<synchronous>, transform_indices = @transform_4, window_bounds = array<i64: 128, 512>}, {pipeline_mode = #tpu.pipeline_mode<synchronous>, transform_indices = @transform_5, window_bounds = array<i64: 1, 512>}, {pipeline_mode = #tpu.pipeline_mode<synchronous>, transform_indices = @transform_6, window_bounds = array<i64: 1, 512>}, {pipeline_mode = #tpu.pipeline_mode<synchronous>, transform_indices = @transform_7, window_bounds = array<i64: 1, 1>}, {transform_indices = @transform_8, window_bounds = array<i64: 8, 1>}]} {
    %c0 = arith.constant 0 : index
    %c0_0 = arith.constant 0 : index
    %0 = vector.load %arg2[%c0, %c0_0] : memref<8x512xf32, #tpu.memory_space<vmem>>, vector<8x512xf32>
    %c0_1 = arith.constant 0 : index
    %c0_2 = arith.constant 0 : index
    %1 = vector.load %arg3[%c0_1, %c0_2] : memref<128x512xf32, #tpu.memory_space<vmem>>, vector<128x512xf32>
    %c0_3 = arith.constant 0 : index
    %c0_4 = arith.constant 0 : index
    %2 = vector.load %arg4[%c0_3, %c0_4] : memref<1x512xf32, #tpu.memory_space<vmem>>, vector<1x512xf32>
    %c0_5 = arith.constant 0 : index
    %c0_6 = arith.constant 0 : index
    %c0_7 = arith.constant 0 : index
    %3 = vector.load %arg1[%c0_5, %c0_6, %c0_7] : memref<8x8x8xf32, #tpu.memory_space<vmem>>, vector<1x8x8xf32>
    %4 = vector.shape_cast %3 : vector<1x8x8xf32> to vector<8x8xf32>
    %cst = arith.constant dense<0.000000e+00> : vector<8x512xf32>
    %5 = tpu.matmul %4, %0, %cst {dimension_numbers = #tpu.dot_dimension_numbers<[1], [0], [0], [1], [0, 0, 1, 1], [], []>} : vector<8x8xf32>, vector<8x512xf32>, vector<8x512xf32> -> vector<8x512xf32>
    %6 = vector.broadcast %2 : vector<1x512xf32> to vector<8x512xf32>
    %7 = arith.addf %5, %6 : vector<8x512xf32>
    %c1 = arith.constant 1 : index
    %c0_8 = arith.constant 0 : index
    %c0_9 = arith.constant 0 : index
    %8 = vector.load %arg1[%c1, %c0_8, %c0_9] : memref<8x8x8xf32, #tpu.memory_space<vmem>>, vector<1x8x8xf32>
    %9 = vector.shape_cast %8 : vector<1x8x8xf32> to vector<8x8xf32>
    %cst_10 = arith.constant dense<0.000000e+00> : vector<8x512xf32>
    %10 = tpu.matmul %9, %0, %cst_10 {dimension_numbers = #tpu.dot_dimension_numbers<[1], [0], [0], [1], [0, 0, 1, 1], [], []>} : vector<8x8xf32>, vector<8x512xf32>, vector<8x512xf32> -> vector<8x512xf32>
    %11 = vector.broadcast %2 : vector<1x512xf32> to vector<8x512xf32>
    %12 = arith.addf %10, %11 : vector<8x512xf32>
    %c2 = arith.constant 2 : index
    %c0_11 = arith.constant 0 : index
    %c0_12 = arith.constant 0 : index
    %13 = vector.load %arg1[%c2, %c0_11, %c0_12] : memref<8x8x8xf32, #tpu.memory_space<vmem>>, vector<1x8x8xf32>
    %14 = vector.shape_cast %13 : vector<1x8x8xf32> to vector<8x8xf32>
    %cst_13 = arith.constant dense<0.000000e+00> : vector<8x512xf32>
    %15 = tpu.matmul %14, %0, %cst_13 {dimension_numbers = #tpu.dot_dimension_numbers<[1], [0], [0], [1], [0, 0, 1, 1], [], []>} : vector<8x8xf32>, vector<8x512xf32>, vector<8x512xf32> -> vector<8x512xf32>
    %16 = vector.broadcast %2 : vector<1x512xf32> to vector<8x512xf32>
    %17 = arith.addf %15, %16 : vector<8x512xf32>
    %c3 = arith.constant 3 : index
    %c0_14 = arith.constant 0 : index
    %c0_15 = arith.constant 0 : index
    %18 = vector.load %arg1[%c3, %c0_14, %c0_15] : memref<8x8x8xf32, #tpu.memory_space<vmem>>, vector<1x8x8xf32>
    %19 = vector.shape_cast %18 : vector<1x8x8xf32> to vector<8x8xf32>
    %cst_16 = arith.constant dense<0.000000e+00> : vector<8x512xf32>
    %20 = tpu.matmul %19, %0, %cst_16 {dimension_numbers = #tpu.dot_dimension_numbers<[1], [0], [0], [1], [0, 0, 1, 1], [], []>} : vector<8x8xf32>, vector<8x512xf32>, vector<8x512xf32> -> vector<8x512xf32>
    %21 = vector.broadcast %2 : vector<1x512xf32> to vector<8x512xf32>
    %22 = arith.addf %20, %21 : vector<8x512xf32>
    %c4 = arith.constant 4 : index
    %c0_17 = arith.constant 0 : index
    %c0_18 = arith.constant 0 : index
    %23 = vector.load %arg1[%c4, %c0_17, %c0_18] : memref<8x8x8xf32, #tpu.memory_space<vmem>>, vector<1x8x8xf32>
    %24 = vector.shape_cast %23 : vector<1x8x8xf32> to vector<8x8xf32>
    %cst_19 = arith.constant dense<0.000000e+00> : vector<8x512xf32>
    %25 = tpu.matmul %24, %0, %cst_19 {dimension_numbers = #tpu.dot_dimension_numbers<[1], [0], [0], [1], [0, 0, 1, 1], [], []>} : vector<8x8xf32>, vector<8x512xf32>, vector<8x512xf32> -> vector<8x512xf32>
    %26 = vector.broadcast %2 : vector<1x512xf32> to vector<8x512xf32>
    %27 = arith.addf %25, %26 : vector<8x512xf32>
    %c5 = arith.constant 5 : index
    %c0_20 = arith.constant 0 : index
    %c0_21 = arith.constant 0 : index
    %28 = vector.load %arg1[%c5, %c0_20, %c0_21] : memref<8x8x8xf32, #tpu.memory_space<vmem>>, vector<1x8x8xf32>
    %29 = vector.shape_cast %28 : vector<1x8x8xf32> to vector<8x8xf32>
    %cst_22 = arith.constant dense<0.000000e+00> : vector<8x512xf32>
    %30 = tpu.matmul %29, %0, %cst_22 {dimension_numbers = #tpu.dot_dimension_numbers<[1], [0], [0], [1], [0, 0, 1, 1], [], []>} : vector<8x8xf32>, vector<8x512xf32>, vector<8x512xf32> -> vector<8x512xf32>
    %31 = vector.broadcast %2 : vector<1x512xf32> to vector<8x512xf32>
    %32 = arith.addf %30, %31 : vector<8x512xf32>
    %c6 = arith.constant 6 : index
    %c0_23 = arith.constant 0 : index
    %c0_24 = arith.constant 0 : index
    %33 = vector.load %arg1[%c6, %c0_23, %c0_24] : memref<8x8x8xf32, #tpu.memory_space<vmem>>, vector<1x8x8xf32>
    %34 = vector.shape_cast %33 : vector<1x8x8xf32> to vector<8x8xf32>
    %cst_25 = arith.constant dense<0.000000e+00> : vector<8x512xf32>
    %35 = tpu.matmul %34, %0, %cst_25 {dimension_numbers = #tpu.dot_dimension_numbers<[1], [0], [0], [1], [0, 0, 1, 1], [], []>} : vector<8x8xf32>, vector<8x512xf32>, vector<8x512xf32> -> vector<8x512xf32>
    %36 = vector.broadcast %2 : vector<1x512xf32> to vector<8x512xf32>
    %37 = arith.addf %35, %36 : vector<8x512xf32>
    %c7 = arith.constant 7 : index
    %c0_26 = arith.constant 0 : index
    %c0_27 = arith.constant 0 : index
    %38 = vector.load %arg1[%c7, %c0_26, %c0_27] : memref<8x8x8xf32, #tpu.memory_space<vmem>>, vector<1x8x8xf32>
    %39 = vector.shape_cast %38 : vector<1x8x8xf32> to vector<8x8xf32>
    %cst_28 = arith.constant dense<0.000000e+00> : vector<8x512xf32>
    %40 = tpu.matmul %39, %0, %cst_28 {dimension_numbers = #tpu.dot_dimension_numbers<[1], [0], [0], [1], [0, 0, 1, 1], [], []>} : vector<8x8xf32>, vector<8x512xf32>, vector<8x512xf32> -> vector<8x512xf32>
    %41 = vector.broadcast %2 : vector<1x512xf32> to vector<8x512xf32>
    %42 = arith.addf %40, %41 : vector<8x512xf32>
    %cst_29 = arith.constant 0.000000e+00 : f32
    %43 = vector.broadcast %cst_29 : f32 to vector<8x128xf32>
    %cst_30 = arith.constant 0.000000e+00 : f32
    %44 = vector.broadcast %cst_30 : f32 to vector<8x128xf32>
    %cst_31 = arith.constant dense<0.000000e+00> : vector<8x512xf32>
    %45 = tpu.matmul %43, %1, %cst_31 {dimension_numbers = #tpu.dot_dimension_numbers<[1], [0], [0], [1], [0, 0, 1, 1], [], []>} : vector<8x128xf32>, vector<128x512xf32>, vector<8x512xf32> -> vector<8x512xf32>
    %46 = arith.addf %7, %45 : vector<8x512xf32>
    %47 = vector.extract_strided_slice %46 {offsets = [0, 0], sizes = [8, 128], strides = [1, 1]} : vector<8x512xf32> to vector<8x128xf32>
    %48 = arith.negf %47 : vector<8x128xf32>
    %49 = math.exp %48 : vector<8x128xf32>
    %cst_32 = arith.constant 1.000000e+00 : f32
    %50 = vector.broadcast %cst_32 : f32 to vector<8x128xf32>
    %51 = arith.addf %50, %49 : vector<8x128xf32>
    %52 = arith.divf %50, %51 : vector<8x128xf32>
    %53 = vector.extract_strided_slice %46 {offsets = [0, 128], sizes = [8, 128], strides = [1, 1]} : vector<8x512xf32> to vector<8x128xf32>
    %54 = arith.negf %53 : vector<8x128xf32>
    %55 = math.exp %54 : vector<8x128xf32>
    %cst_33 = arith.constant 1.000000e+00 : f32
    %56 = vector.broadcast %cst_33 : f32 to vector<8x128xf32>
    %57 = arith.addf %56, %55 : vector<8x128xf32>
    %58 = arith.divf %56, %57 : vector<8x128xf32>
    %59 = vector.extract_strided_slice %46 {offsets = [0, 256], sizes = [8, 128], strides = [1, 1]} : vector<8x512xf32> to vector<8x128xf32>
    %60 = math.tanh %59 : vector<8x128xf32>
    %61 = vector.extract_strided_slice %46 {offsets = [0, 384], sizes = [8, 128], strides = [1, 1]} : vector<8x512xf32> to vector<8x128xf32>
    %62 = arith.negf %61 : vector<8x128xf32>
    %63 = math.exp %62 : vector<8x128xf32>
    %cst_34 = arith.constant 1.000000e+00 : f32
    %64 = vector.broadcast %cst_34 : f32 to vector<8x128xf32>
    %65 = arith.addf %64, %63 : vector<8x128xf32>
    %66 = arith.divf %64, %65 : vector<8x128xf32>
    %67 = arith.mulf %58, %44 : vector<8x128xf32>
    %68 = arith.mulf %52, %60 : vector<8x128xf32>
    %69 = arith.addf %67, %68 : vector<8x128xf32>
    %70 = math.tanh %69 : vector<8x128xf32>
    %71 = arith.mulf %66, %70 : vector<8x128xf32>
    %cst_35 = arith.constant dense<0.000000e+00> : vector<8x512xf32>
    %72 = tpu.matmul %71, %1, %cst_35 {dimension_numbers = #tpu.dot_dimension_numbers<[1], [0], [0], [1], [0, 0, 1, 1], [], []>} : vector<8x128xf32>, vector<128x512xf32>, vector<8x512xf32> -> vector<8x512xf32>
    %73 = arith.addf %12, %72 : vector<8x512xf32>
    %74 = vector.extract_strided_slice %73 {offsets = [0, 0], sizes = [8, 128], strides = [1, 1]} : vector<8x512xf32> to vector<8x128xf32>
    %75 = arith.negf %74 : vector<8x128xf32>
    %76 = math.exp %75 : vector<8x128xf32>
    %cst_36 = arith.constant 1.000000e+00 : f32
    %77 = vector.broadcast %cst_36 : f32 to vector<8x128xf32>
    %78 = arith.addf %77, %76 : vector<8x128xf32>
    %79 = arith.divf %77, %78 : vector<8x128xf32>
    %80 = vector.extract_strided_slice %73 {offsets = [0, 128], sizes = [8, 128], strides = [1, 1]} : vector<8x512xf32> to vector<8x128xf32>
    %81 = arith.negf %80 : vector<8x128xf32>
    %82 = math.exp %81 : vector<8x128xf32>
    %cst_37 = arith.constant 1.000000e+00 : f32
    %83 = vector.broadcast %cst_37 : f32 to vector<8x128xf32>
    %84 = arith.addf %83, %82 : vector<8x128xf32>
    %85 = arith.divf %83, %84 : vector<8x128xf32>
    %86 = vector.extract_strided_slice %73 {offsets = [0, 256], sizes = [8, 128], strides = [1, 1]} : vector<8x512xf32> to vector<8x128xf32>
    %87 = math.tanh %86 : vector<8x128xf32>
    %88 = vector.extract_strided_slice %73 {offsets = [0, 384], sizes = [8, 128], strides = [1, 1]} : vector<8x512xf32> to vector<8x128xf32>
    %89 = arith.negf %88 : vector<8x128xf32>
    %90 = math.exp %89 : vector<8x128xf32>
    %cst_38 = arith.constant 1.000000e+00 : f32
    %91 = vector.broadcast %cst_38 : f32 to vector<8x128xf32>
    %92 = arith.addf %91, %90 : vector<8x128xf32>
    %93 = arith.divf %91, %92 : vector<8x128xf32>
    %94 = arith.mulf %85, %69 : vector<8x128xf32>
    %95 = arith.mulf %79, %87 : vector<8x128xf32>
    %96 = arith.addf %94, %95 : vector<8x128xf32>
    %97 = math.tanh %96 : vector<8x128xf32>
    %98 = arith.mulf %93, %97 : vector<8x128xf32>
    %cst_39 = arith.constant dense<0.000000e+00> : vector<8x512xf32>
    %99 = tpu.matmul %98, %1, %cst_39 {dimension_numbers = #tpu.dot_dimension_numbers<[1], [0], [0], [1], [0, 0, 1, 1], [], []>} : vector<8x128xf32>, vector<128x512xf32>, vector<8x512xf32> -> vector<8x512xf32>
    %100 = arith.addf %17, %99 : vector<8x512xf32>
    %101 = vector.extract_strided_slice %100 {offsets = [0, 0], sizes = [8, 128], strides = [1, 1]} : vector<8x512xf32> to vector<8x128xf32>
    %102 = arith.negf %101 : vector<8x128xf32>
    %103 = math.exp %102 : vector<8x128xf32>
    %cst_40 = arith.constant 1.000000e+00 : f32
    %104 = vector.broadcast %cst_40 : f32 to vector<8x128xf32>
    %105 = arith.addf %104, %103 : vector<8x128xf32>
    %106 = arith.divf %104, %105 : vector<8x128xf32>
    %107 = vector.extract_strided_slice %100 {offsets = [0, 128], sizes = [8, 128], strides = [1, 1]} : vector<8x512xf32> to vector<8x128xf32>
    %108 = arith.negf %107 : vector<8x128xf32>
    %109 = math.exp %108 : vector<8x128xf32>
    %cst_41 = arith.constant 1.000000e+00 : f32
    %110 = vector.broadcast %cst_41 : f32 to vector<8x128xf32>
    %111 = arith.addf %110, %109 : vector<8x128xf32>
    %112 = arith.divf %110, %111 : vector<8x128xf32>
    %113 = vector.extract_strided_slice %100 {offsets = [0, 256], sizes = [8, 128], strides = [1, 1]} : vector<8x512xf32> to vector<8x128xf32>
    %114 = math.tanh %113 : vector<8x128xf32>
    %115 = vector.extract_strided_slice %100 {offsets = [0, 384], sizes = [8, 128], strides = [1, 1]} : vector<8x512xf32> to vector<8x128xf32>
    %116 = arith.negf %115 : vector<8x128xf32>
    %117 = math.exp %116 : vector<8x128xf32>
    %cst_42 = arith.constant 1.000000e+00 : f32
    %118 = vector.broadcast %cst_42 : f32 to vector<8x128xf32>
    %119 = arith.addf %118, %117 : vector<8x128xf32>
    %120 = arith.divf %118, %119 : vector<8x128xf32>
    %121 = arith.mulf %112, %96 : vector<8x128xf32>
    %122 = arith.mulf %106, %114 : vector<8x128xf32>
    %123 = arith.addf %121, %122 : vector<8x128xf32>
    %124 = math.tanh %123 : vector<8x128xf32>
    %125 = arith.mulf %120, %124 : vector<8x128xf32>
    %cst_43 = arith.constant dense<0.000000e+00> : vector<8x512xf32>
    %126 = tpu.matmul %125, %1, %cst_43 {dimension_numbers = #tpu.dot_dimension_numbers<[1], [0], [0], [1], [0, 0, 1, 1], [], []>} : vector<8x128xf32>, vector<128x512xf32>, vector<8x512xf32> -> vector<8x512xf32>
    %127 = arith.addf %22, %126 : vector<8x512xf32>
    %128 = vector.extract_strided_slice %127 {offsets = [0, 0], sizes = [8, 128], strides = [1, 1]} : vector<8x512xf32> to vector<8x128xf32>
    %129 = arith.negf %128 : vector<8x128xf32>
    %130 = math.exp %129 : vector<8x128xf32>
    %cst_44 = arith.constant 1.000000e+00 : f32
    %131 = vector.broadcast %cst_44 : f32 to vector<8x128xf32>
    %132 = arith.addf %131, %130 : vector<8x128xf32>
    %133 = arith.divf %131, %132 : vector<8x128xf32>
    %134 = vector.extract_strided_slice %127 {offsets = [0, 128], sizes = [8, 128], strides = [1, 1]} : vector<8x512xf32> to vector<8x128xf32>
    %135 = arith.negf %134 : vector<8x128xf32>
    %136 = math.exp %135 : vector<8x128xf32>
    %cst_45 = arith.constant 1.000000e+00 : f32
    %137 = vector.broadcast %cst_45 : f32 to vector<8x128xf32>
    %138 = arith.addf %137, %136 : vector<8x128xf32>
    %139 = arith.divf %137, %138 : vector<8x128xf32>
    %140 = vector.extract_strided_slice %127 {offsets = [0, 256], sizes = [8, 128], strides = [1, 1]} : vector<8x512xf32> to vector<8x128xf32>
    %141 = math.tanh %140 : vector<8x128xf32>
    %142 = vector.extract_strided_slice %127 {offsets = [0, 384], sizes = [8, 128], strides = [1, 1]} : vector<8x512xf32> to vector<8x128xf32>
    %143 = arith.negf %142 : vector<8x128xf32>
    %144 = math.exp %143 : vector<8x128xf32>
    %cst_46 = arith.constant 1.000000e+00 : f32
    %145 = vector.broadcast %cst_46 : f32 to vector<8x128xf32>
    %146 = arith.addf %145, %144 : vector<8x128xf32>
    %147 = arith.divf %145, %146 : vector<8x128xf32>
    %148 = arith.mulf %139, %123 : vector<8x128xf32>
    %149 = arith.mulf %133, %141 : vector<8x128xf32>
    %150 = arith.addf %148, %149 : vector<8x128xf32>
    %151 = math.tanh %150 : vector<8x128xf32>
    %152 = arith.mulf %147, %151 : vector<8x128xf32>
    %cst_47 = arith.constant dense<0.000000e+00> : vector<8x512xf32>
    %153 = tpu.matmul %152, %1, %cst_47 {dimension_numbers = #tpu.dot_dimension_numbers<[1], [0], [0], [1], [0, 0, 1, 1], [], []>} : vector<8x128xf32>, vector<128x512xf32>, vector<8x512xf32> -> vector<8x512xf32>
    %154 = arith.addf %27, %153 : vector<8x512xf32>
    %155 = vector.extract_strided_slice %154 {offsets = [0, 0], sizes = [8, 128], strides = [1, 1]} : vector<8x512xf32> to vector<8x128xf32>
    %156 = arith.negf %155 : vector<8x128xf32>
    %157 = math.exp %156 : vector<8x128xf32>
    %cst_48 = arith.constant 1.000000e+00 : f32
    %158 = vector.broadcast %cst_48 : f32 to vector<8x128xf32>
    %159 = arith.addf %158, %157 : vector<8x128xf32>
    %160 = arith.divf %158, %159 : vector<8x128xf32>
    %161 = vector.extract_strided_slice %154 {offsets = [0, 128], sizes = [8, 128], strides = [1, 1]} : vector<8x512xf32> to vector<8x128xf32>
    %162 = arith.negf %161 : vector<8x128xf32>
    %163 = math.exp %162 : vector<8x128xf32>
    %cst_49 = arith.constant 1.000000e+00 : f32
    %164 = vector.broadcast %cst_49 : f32 to vector<8x128xf32>
    %165 = arith.addf %164, %163 : vector<8x128xf32>
    %166 = arith.divf %164, %165 : vector<8x128xf32>
    %167 = vector.extract_strided_slice %154 {offsets = [0, 256], sizes = [8, 128], strides = [1, 1]} : vector<8x512xf32> to vector<8x128xf32>
    %168 = math.tanh %167 : vector<8x128xf32>
    %169 = vector.extract_strided_slice %154 {offsets = [0, 384], sizes = [8, 128], strides = [1, 1]} : vector<8x512xf32> to vector<8x128xf32>
    %170 = arith.negf %169 : vector<8x128xf32>
    %171 = math.exp %170 : vector<8x128xf32>
    %cst_50 = arith.constant 1.000000e+00 : f32
    %172 = vector.broadcast %cst_50 : f32 to vector<8x128xf32>
    %173 = arith.addf %172, %171 : vector<8x128xf32>
    %174 = arith.divf %172, %173 : vector<8x128xf32>
    %175 = arith.mulf %166, %150 : vector<8x128xf32>
    %176 = arith.mulf %160, %168 : vector<8x128xf32>
    %177 = arith.addf %175, %176 : vector<8x128xf32>
    %178 = math.tanh %177 : vector<8x128xf32>
    %179 = arith.mulf %174, %178 : vector<8x128xf32>
    %cst_51 = arith.constant dense<0.000000e+00> : vector<8x512xf32>
    %180 = tpu.matmul %179, %1, %cst_51 {dimension_numbers = #tpu.dot_dimension_numbers<[1], [0], [0], [1], [0, 0, 1, 1], [], []>} : vector<8x128xf32>, vector<128x512xf32>, vector<8x512xf32> -> vector<8x512xf32>
    %181 = arith.addf %32, %180 : vector<8x512xf32>
    %182 = vector.extract_strided_slice %181 {offsets = [0, 0], sizes = [8, 128], strides = [1, 1]} : vector<8x512xf32> to vector<8x128xf32>
    %183 = arith.negf %182 : vector<8x128xf32>
    %184 = math.exp %183 : vector<8x128xf32>
    %cst_52 = arith.constant 1.000000e+00 : f32
    %185 = vector.broadcast %cst_52 : f32 to vector<8x128xf32>
    %186 = arith.addf %185, %184 : vector<8x128xf32>
    %187 = arith.divf %185, %186 : vector<8x128xf32>
    %188 = vector.extract_strided_slice %181 {offsets = [0, 128], sizes = [8, 128], strides = [1, 1]} : vector<8x512xf32> to vector<8x128xf32>
    %189 = arith.negf %188 : vector<8x128xf32>
    %190 = math.exp %189 : vector<8x128xf32>
    %cst_53 = arith.constant 1.000000e+00 : f32
    %191 = vector.broadcast %cst_53 : f32 to vector<8x128xf32>
    %192 = arith.addf %191, %190 : vector<8x128xf32>
    %193 = arith.divf %191, %192 : vector<8x128xf32>
    %194 = vector.extract_strided_slice %181 {offsets = [0, 256], sizes = [8, 128], strides = [1, 1]} : vector<8x512xf32> to vector<8x128xf32>
    %195 = math.tanh %194 : vector<8x128xf32>
    %196 = vector.extract_strided_slice %181 {offsets = [0, 384], sizes = [8, 128], strides = [1, 1]} : vector<8x512xf32> to vector<8x128xf32>
    %197 = arith.negf %196 : vector<8x128xf32>
    %198 = math.exp %197 : vector<8x128xf32>
    %cst_54 = arith.constant 1.000000e+00 : f32
    %199 = vector.broadcast %cst_54 : f32 to vector<8x128xf32>
    %200 = arith.addf %199, %198 : vector<8x128xf32>
    %201 = arith.divf %199, %200 : vector<8x128xf32>
    %202 = arith.mulf %193, %177 : vector<8x128xf32>
    %203 = arith.mulf %187, %195 : vector<8x128xf32>
    %204 = arith.addf %202, %203 : vector<8x128xf32>
    %205 = math.tanh %204 : vector<8x128xf32>
    %206 = arith.mulf %201, %205 : vector<8x128xf32>
    %cst_55 = arith.constant dense<0.000000e+00> : vector<8x512xf32>
    %207 = tpu.matmul %206, %1, %cst_55 {dimension_numbers = #tpu.dot_dimension_numbers<[1], [0], [0], [1], [0, 0, 1, 1], [], []>} : vector<8x128xf32>, vector<128x512xf32>, vector<8x512xf32> -> vector<8x512xf32>
    %208 = arith.addf %37, %207 : vector<8x512xf32>
    %209 = vector.extract_strided_slice %208 {offsets = [0, 0], sizes = [8, 128], strides = [1, 1]} : vector<8x512xf32> to vector<8x128xf32>
    %210 = arith.negf %209 : vector<8x128xf32>
    %211 = math.exp %210 : vector<8x128xf32>
    %cst_56 = arith.constant 1.000000e+00 : f32
    %212 = vector.broadcast %cst_56 : f32 to vector<8x128xf32>
    %213 = arith.addf %212, %211 : vector<8x128xf32>
    %214 = arith.divf %212, %213 : vector<8x128xf32>
    %215 = vector.extract_strided_slice %208 {offsets = [0, 128], sizes = [8, 128], strides = [1, 1]} : vector<8x512xf32> to vector<8x128xf32>
    %216 = arith.negf %215 : vector<8x128xf32>
    %217 = math.exp %216 : vector<8x128xf32>
    %cst_57 = arith.constant 1.000000e+00 : f32
    %218 = vector.broadcast %cst_57 : f32 to vector<8x128xf32>
    %219 = arith.addf %218, %217 : vector<8x128xf32>
    %220 = arith.divf %218, %219 : vector<8x128xf32>
    %221 = vector.extract_strided_slice %208 {offsets = [0, 256], sizes = [8, 128], strides = [1, 1]} : vector<8x512xf32> to vector<8x128xf32>
    %222 = math.tanh %221 : vector<8x128xf32>
    %223 = vector.extract_strided_slice %208 {offsets = [0, 384], sizes = [8, 128], strides = [1, 1]} : vector<8x512xf32> to vector<8x128xf32>
    %224 = arith.negf %223 : vector<8x128xf32>
    %225 = math.exp %224 : vector<8x128xf32>
    %cst_58 = arith.constant 1.000000e+00 : f32
    %226 = vector.broadcast %cst_58 : f32 to vector<8x128xf32>
    %227 = arith.addf %226, %225 : vector<8x128xf32>
    %228 = arith.divf %226, %227 : vector<8x128xf32>
    %229 = arith.mulf %220, %204 : vector<8x128xf32>
    %230 = arith.mulf %214, %222 : vector<8x128xf32>
    %231 = arith.addf %229, %230 : vector<8x128xf32>
    %232 = math.tanh %231 : vector<8x128xf32>
    %233 = arith.mulf %228, %232 : vector<8x128xf32>
    %cst_59 = arith.constant dense<0.000000e+00> : vector<8x512xf32>
    %234 = tpu.matmul %233, %1, %cst_59 {dimension_numbers = #tpu.dot_dimension_numbers<[1], [0], [0], [1], [0, 0, 1, 1], [], []>} : vector<8x128xf32>, vector<128x512xf32>, vector<8x512xf32> -> vector<8x512xf32>
    %235 = arith.addf %42, %234 : vector<8x512xf32>
    %236 = vector.extract_strided_slice %235 {offsets = [0, 0], sizes = [8, 128], strides = [1, 1]} : vector<8x512xf32> to vector<8x128xf32>
    %237 = arith.negf %236 : vector<8x128xf32>
    %238 = math.exp %237 : vector<8x128xf32>
    %cst_60 = arith.constant 1.000000e+00 : f32
    %239 = vector.broadcast %cst_60 : f32 to vector<8x128xf32>
    %240 = arith.addf %239, %238 : vector<8x128xf32>
    %241 = arith.divf %239, %240 : vector<8x128xf32>
    %242 = vector.extract_strided_slice %235 {offsets = [0, 128], sizes = [8, 128], strides = [1, 1]} : vector<8x512xf32> to vector<8x128xf32>
    %243 = arith.negf %242 : vector<8x128xf32>
    %244 = math.exp %243 : vector<8x128xf32>
    %cst_61 = arith.constant 1.000000e+00 : f32
    %245 = vector.broadcast %cst_61 : f32 to vector<8x128xf32>
    %246 = arith.addf %245, %244 : vector<8x128xf32>
    %247 = arith.divf %245, %246 : vector<8x128xf32>
    %248 = vector.extract_strided_slice %235 {offsets = [0, 256], sizes = [8, 128], strides = [1, 1]} : vector<8x512xf32> to vector<8x128xf32>
    %249 = math.tanh %248 : vector<8x128xf32>
    %250 = vector.extract_strided_slice %235 {offsets = [0, 384], sizes = [8, 128], strides = [1, 1]} : vector<8x512xf32> to vector<8x128xf32>
    %251 = arith.negf %250 : vector<8x128xf32>
    %252 = math.exp %251 : vector<8x128xf32>
    %cst_62 = arith.constant 1.000000e+00 : f32
    %253 = vector.broadcast %cst_62 : f32 to vector<8x128xf32>
    %254 = arith.addf %253, %252 : vector<8x128xf32>
    %255 = arith.divf %253, %254 : vector<8x128xf32>
    %256 = arith.mulf %247, %231 : vector<8x128xf32>
    %257 = arith.mulf %241, %249 : vector<8x128xf32>
    %258 = arith.addf %256, %257 : vector<8x128xf32>
    %259 = math.tanh %258 : vector<8x128xf32>
    %260 = arith.mulf %255, %259 : vector<8x128xf32>
    %cst_63 = arith.constant 0.000000e+00 : f32
    %261 = vector.broadcast %cst_63 : f32 to vector<8x128xf32>
    %262 = arith.maximumf %260, %261 : vector<8x128xf32>
    %c0_64 = arith.constant 0 : index
    %c0_65 = arith.constant 0 : index
    %263 = vector.load %arg5[%c0_64, %c0_65] : memref<128x512xf32, #tpu.memory_space<vmem>>, vector<128x512xf32>
    %cst_66 = arith.constant dense<0.000000e+00> : vector<8x512xf32>
    %264 = tpu.matmul %262, %263, %cst_66 {dimension_numbers = #tpu.dot_dimension_numbers<[1], [0], [0], [1], [0, 0, 1, 1], [], []>} : vector<8x128xf32>, vector<128x512xf32>, vector<8x512xf32> -> vector<8x512xf32>
    %c0_67 = arith.constant 0 : index
    %c0_68 = arith.constant 0 : index
    %265 = vector.load %arg6[%c0_67, %c0_68] : memref<1x512xf32, #tpu.memory_space<vmem>>, vector<1x512xf32>
    %266 = vector.broadcast %265 : vector<1x512xf32> to vector<8x512xf32>
    %267 = arith.addf %264, %266 : vector<8x512xf32>
    %cst_69 = arith.constant 0.000000e+00 : f32
    %268 = vector.broadcast %cst_69 : f32 to vector<8x512xf32>
    %269 = arith.maximumf %267, %268 : vector<8x512xf32>
    %c0_70 = arith.constant 0 : index
    %c0_71 = arith.constant 0 : index
    %270 = vector.load %arg7[%c0_70, %c0_71] : memref<1x512xf32, #tpu.memory_space<vmem>>, vector<1x512xf32>
    %271 = vector.broadcast %270 : vector<1x512xf32> to vector<8x512xf32>
    %272 = arith.mulf %269, %271 : vector<8x512xf32>
    %cst_72 = arith.constant dense<0.000000e+00> : vector<8xf32>
    %273 = vector.multi_reduction <add>, %272, %cst_72 [1] : vector<8x512xf32> to vector<8xf32>
    %274 = vector.shape_cast %273 : vector<8xf32> to vector<8x1xf32>
    %c0_73 = arith.constant 0 : index
    %c0_74 = arith.constant 0 : index
    %275 = vector.load %arg8[%c0_73, %c0_74] : memref<1x1xf32, #tpu.memory_space<vmem>>, vector<1x1xf32>
    %276 = vector.broadcast %275 : vector<1x1xf32> to vector<8x1xf32>
    %277 = arith.addf %274, %276 : vector<8x1xf32>
    %c0_75 = arith.constant 0 : index
    %c0_76 = arith.constant 0 : index
    %278 = vector.load %arg9[%c0_75, %c0_76] : memref<8x1xf32, #tpu.memory_space<vmem>>, vector<8x1xf32>
    tpu.vector_store %arg9[%c0_75, %c0_76], %277 {strides = array<i32>} : memref<8x1xf32, #tpu.memory_space<vmem>>, vector<8x1xf32>,
    return
  }
  func.func @transform_0(%arg0: i32) -> (i32, i32, i32) {
    %c0_i32 = arith.constant 0 : i32
    %c0_i32_0 = arith.constant 0 : i32
    %c0_i32_1 = arith.constant 0 : i32
    return %c0_i32, %arg0, %c0_i32_0 : i32, i32, i32
  }
  func.func @transform_1(%arg0: i32) -> (i32, i32) {
    %c0_i32 = arith.constant 0 : i32
    %c0_i32_0 = arith.constant 0 : i32
    %c0_i32_1 = arith.constant 0 : i32
    return %c0_i32, %c0_i32_0 : i32, i32
  }
  func.func @transform_2(%arg0: i32) -> (i32, i32) {
    %c0_i32 = arith.constant 0 : i32
    %c0_i32_0 = arith.constant 0 : i32
    %c0_i32_1 = arith.constant 0 : i32
    return %c0_i32, %c0_i32_0 : i32, i32
  }
  func.func @transform_3(%arg0: i32) -> (i32, i32) {
    %c0_i32 = arith.constant 0 : i32
    %c0_i32_0 = arith.constant 0 : i32
    %c0_i32_1 = arith.constant 0 : i32
    return %c0_i32, %c0_i32_0 : i32, i32
  }
  func.func @transform_4(%arg0: i32) -> (i32, i32) {
    %c0_i32 = arith.constant 0 : i32
    %c0_i32_0 = arith.constant 0 : i32
    %c0_i32_1 = arith.constant 0 : i32
    return %c0_i32, %c0_i32_0 : i32, i32
  }
  func.func @transform_5(%arg0: i32) -> (i32, i32) {
    %c0_i32 = arith.constant 0 : i32
    %c0_i32_0 = arith.constant 0 : i32
    %c0_i32_1 = arith.constant 0 : i32
    return %c0_i32, %c0_i32_0 : i32, i32
  }
  func.func @transform_6(%arg0: i32) -> (i32, i32) {
    %c0_i32 = arith.constant 0 : i32
    %c0_i32_0 = arith.constant 0 : i32
    %c0_i32_1 = arith.constant 0 : i32
    return %c0_i32, %c0_i32_0 : i32, i32
  }
  func.func @transform_7(%arg0: i32) -> (i32, i32) {
    %c0_i32 = arith.constant 0 : i32
    %c0_i32_0 = arith.constant 0 : i32
    %c0_i32_1 = arith.constant 0 : i32
    return %c0_i32, %c0_i32_0 : i32, i32
  }
  func.func @transform_8(%arg0: i32) -> (i32, i32) {
    %c0_i32 = arith.constant 0 : i32
    %c0_i32_0 = arith.constant 0 : i32
    return %arg0, %c0_i32 : i32, i32
  }
}

</mosaic_0001>

<bundles_post_ra>
// kernel: tpu_custom_call.1
= control target key start
LH: loop header
LB: loop body
LE: loop exit
PB: predicated region body
PF: predicated region fallthrough
CT: control target
= control target key end

     0   :  { %s4527_s0 = inlined_call_operand.hbm [shape: f32[8,8,8], index: 0, kind: input, shape index: {}]   ;;  %s4528_s1 = inlined_call_operand.hbm [shape: f32[8,512], index: 1, kind: input, shape index: {}]   ;;  %s4529_s2 = inlined_call_operand.hbm [shape: f32[128,512], index: 2, kind: input, shape index: {}]   ;;  %s4530_s3 = inlined_call_operand.vmem [shape: f32[1,512], index: 3, kind: input, shape index: {}]   ;;  %s4531_s4 = inlined_call_operand.hbm [shape: f32[128,512], index: 4, kind: input, shape index: {}]   ;;  %s4532_s5 = inlined_call_operand.vmem [shape: f32[1,512], index: 5, kind: input, shape index: {}]   ;;  %s4533_s6 = inlined_call_operand.vmem [shape: f32[1,512], index: 6, kind: input, shape index: {}]   ;;  %s4534_s7 = inlined_call_operand.<no memory space> [shape: f32[1,1], index: 7, kind: input, shape index: {}]   ;;  %s4535_s8 = inlined_call_operand.vmem [shape: f32[8,1], index: 8, kind: output, shape index: {}]  }
   0x1   :  { %v13_v0 = vstv %s4534_s7 }
   0x2   :  { %14 = vst [vmem:[#allocation2] sm:$0x1] %v13_v0 }
   0x3   :  { %15 = vsyncpa [#allocation4], 0 }
   0x4   :  { %16 = vsyncpa [#allocation6], 0 }
   0x5   :  { %17 = vsyncpa [#allocation9], 0  ;;  %s3903_s29 = smov [#allocation5]   ;;  %s3904_s9 = smov [#allocation3]  }
   0x6   :  { %s36_s30 = sshll.u32 %s3903_s29, 4  ;;  %s23_s10 = sshll.u32 %s3904_s9, 4  ;;  %s37_s30 = int_to_ptr.vmem [resolvable:$true] %s36_s30  ;;  %s3960_s10 = int_to_ptr.vmem [resolvable:$true] %s23_s10 }
   0x7   :  { %s3809_s13 = scalar_lea.hbm %s4528_s1, 512 }
   0x8   :  { %p3810_p0 = scmp.ne.s32.totalorder %s4528_s1, %s3809_s13  ;;  %p3813_p1 = scmp.lt.u32.totalorder %s3809_s13, %s4528_s1 }
   0xa   :  { %p3815_p2 = pnand %p3813_p1, %p3810_p0 }
   0xc   :  { %3818 = shalt.err (!%p3815_p2)
}
   0xd   :  { %s3819_s17 = scalar_lea.vmem %s37_s30, 512  ;;  %p3824_p4 = scmp.lt.s32.totalorder %s37_s30, %s37_s30 }
   0xe   :  { %p3820_p3 = scmp.ne.s32.totalorder %s37_s30, %s3819_s17  ;;  %p3825_p5 = scmp.lt.s32.totalorder %s3819_s17, %s3819_s17 }
  0x10   :  { %p3826_p6 = por %p3825_p5, %p3824_p4 }
  0x12   :  { %p3827_p7 = pnand %p3826_p6, %p3820_p3 }
  0x14   :  { %3830 = shalt.err (!%p3827_p7)
}
  0x15   :  { %39 = dma.hbm_to_vmem [thread:$0]  %s4528_s1, 512, %s37_s30, [#allocation6]  }
  0x16   :  { %s3831_s22 = scalar_lea.hbm %s4527_s0, 1024 }
  0x17   :  { %p3832_p8 = scmp.ne.s32.totalorder %s4527_s0, %s3831_s22  ;;  %p3835_p9 = scmp.lt.u32.totalorder %s3831_s22, %s4527_s0 }
  0x19   :  { %p3837_p10 = pnand %p3835_p9, %p3832_p8 }
  0x1b   :  { %3840 = shalt.err (!%p3837_p10)
}
  0x1c   :  { %s3841_s27 = scalar_lea.vmem %s3960_s10, 1024  ;;  %p3846_p12 = scmp.lt.s32.totalorder %s3960_s10, %s3960_s10 }
  0x1d   :  { %p3842_p11 = scmp.ne.s32.totalorder %s3960_s10, %s3841_s27  ;;  %p3847_p13 = scmp.lt.s32.totalorder %s3841_s27, %s3841_s27 }
  0x1f   :  { %p3848_p0 = por %p3847_p13, %p3846_p12 }
  0x21   :  { %p3849_p1 = pnand %p3848_p0, %p3842_p11 }
  0x23   :  { %3852 = shalt.err (!%p3849_p1)
}
  0x24   :  { %s3905_s1 = smov 128   ;;  %s3906_s28 = smov 8  }
  0x25   :  { %29 = dma.hbm_to_vmem [thread:$0]  %s4527_s0, 1024, %s3960_s10, [#allocation4], %s3905_s1, %s3905_s1, %s3906_s28  }
  0x26   :  { %s3907_s9 = smov [#allocation7]   ;;  %s3853_s14 = scalar_lea.hbm %s4529_s2, 8192 }
  0x27   :  { %s45_s11 = sshll.u32 %s3907_s9, 4  ;;  %p3854_p2 = scmp.ne.s32.totalorder %s4529_s2, %s3853_s14  ;;  %s46_s11 = int_to_ptr.vmem [resolvable:$true] %s45_s11 }
  0x28   :  { %p3857_p3 = scmp.lt.u32.totalorder %s3853_s14, %s4529_s2 }
  0x2a   :  { %p3859_p4 = pnand %p3857_p3, %p3854_p2 }
  0x2c   :  { %3862 = shalt.err (!%p3859_p4)
}
  0x2d   :  { %s3863_s18 = scalar_lea.vmem %s46_s11, 8192  ;;  %p3868_p6 = scmp.lt.s32.totalorder %s46_s11, %s46_s11 }
  0x2e   :  { %p3864_p5 = scmp.ne.s32.totalorder %s46_s11, %s3863_s18  ;;  %p3869_p7 = scmp.lt.s32.totalorder %s3863_s18, %s3863_s18 }
  0x30   :  { %p3870_p8 = por %p3869_p7, %p3868_p6 }
  0x32   :  { %p3871_p9 = pnand %p3870_p8, %p3864_p5 }
  0x34   :  { %3874 = shalt.err (!%p3871_p9)
}
  0x35   :  { %s3908_s0 = smov 512   ;;  %s3909_s10 = smov 32  }
  0x36   :  { %51 = dma.hbm_to_vmem [thread:$0]  %s4529_s2, 8192, %s46_s11, [#allocation6], %s3908_s0, %s3908_s0, %s3909_s10  }
  0x37   :  { %s3910_s21 = smov [#allocation8]   ;;  %s3875_s25 = scalar_lea.hbm %s4531_s4, 8192 }
  0x38   :  { %s59_s22 = sshll.u32 %s3910_s21, 4  ;;  %p3876_p10 = scmp.ne.s32.totalorder %s4531_s4, %s3875_s25  ;;  %s60_s22 = int_to_ptr.vmem [resolvable:$true] %s59_s22 }
  0x39   :  { %p3879_p11 = scmp.lt.u32.totalorder %s3875_s25, %s4531_s4 }
  0x3b   :  { %p3881_p12 = pnand %p3879_p11, %p3876_p10 }
  0x3d   :  { %3884 = shalt.err (!%p3881_p12)
}
  0x3e   :  { %s3885_s29 = scalar_lea.vmem %s60_s22, 8192  ;;  %p3890_p0 = scmp.lt.s32.totalorder %s60_s22, %s60_s22 }
  0x3f   :  { %p3886_p13 = scmp.ne.s32.totalorder %s60_s22, %s3885_s29  ;;  %p3891_p1 = scmp.lt.s32.totalorder %s3885_s29, %s3885_s29 }
  0x41   :  { %p3892_p2 = por %p3891_p1, %p3890_p0 }
  0x43   :  { %p3893_p3 = pnand %p3892_p2, %p3886_p13 }
  0x45   :  { %3896 = shalt.err (!%p3893_p3)
}
  0x46   :  { %65 = dma.hbm_to_vmem [thread:$0]  %s4531_s4, 8192, %s60_s22, [#allocation9], %s3908_s0, %s3908_s0, %s3909_s10  }
  0x47   :  { %3897 = dma.done.wait [#allocation4], 1024  }
  0x48   :  { %3898 = vsyncadd [#allocation4], 4294966272 }
  0x49   :  { %3899 = dma.done.wait [#allocation6], 8704  }
  0x4a   :  { %3900 = vsyncadd [#allocation6], 4294958592 }
  0x4b   :  { %3901 = dma.done.wait [#allocation9], 8192  }
  0x4c   :  { %3902 = vsyncadd [#allocation9], 4294959104  ;;  %v3911_v1 = vmov 0.0   ;;  %v4017_v2 = vld [vmem:[#allocation5 + $0x8] sm:$0xff]  ;;  %v4019_v3 = vld [vmem:[#allocation5 + $0x18] sm:$0xff]  ;;  %vm175_vm0 = vcmask 64512  }
  0x4d   :  { %243 = vmatprep.mubr.f32.mxu0 %v3911_v1  ;;  %314 = vmatprep.mubr.f32.mxu1 %v3911_v1  ;;  %v4021_v4 = vld [vmem:[#allocation5] sm:$0xff]  ;;  %v4025_v5 = vld [vmem:[#allocation5 + $0x10] sm:$0xff]  ;;  %v322_v7 = vld [vmem:[#allocation3 + $0x8] sm:$0xff]  ;;  %vm2982_vm1 = vcmask 7168  }
  0x4e   :  { %179 = vmatprep.subr.mxu0 %v4017_v2  ;;  %250 = vmatprep.subr.mxu1 %v4019_v3  ;;  %v153_v6 = vld [vmem:[#allocation3] sm:$0xff]  ;;  %v469_v8 = vld [vmem:[#allocation3 + $0x10] sm:$0xff]  ;;  %v616_v9 = vld [vmem:[#allocation3 + $0x18] sm:$0xff] }
  0x4f   :  { %180 = vmatpush1.msra.mxu0 %v4021_v4  ;;  %251 = vmatpush1.msra.mxu1 %v4025_v5  ;;  %v763_v10 = vld [vmem:[#allocation3 + $0x20] sm:$0xff]  ;;  %v910_v11 = vld [vmem:[#allocation3 + $0x28] sm:$0xff]  ;;  %v1057_v12 = vld [vmem:[#allocation3 + $0x30] sm:$0xff] }
  0x50   :  { %2991 = vmatmul.mubr.msk.f32.vlgmr.msra.gmra.mrb[0].mxu0 %vm175_vm0, %v153_v6  ;;  %2992 = vmatmul.mubr.msk.f32.vlgmr.msra.gmra.mrb[0].mxu1 %vm175_vm0, %v153_v6  ;;  %v89_v13 = vld [vmem:[#allocation7 + $0x8] sm:$0xff]  ;;  %v91_v15 = vld [vmem:[#allocation7 + $0x18] sm:$0xff]  ;;  %v88_v17 = vld [vmem:[#allocation7] sm:$0xff] }
  0x51   :  { %326 = vmatprep.subr.mxu0 %v4017_v2  ;;  %397 = vmatprep.subr.mxu1 %v4019_v3  ;;  %v93_v14 = vld [vmem:[#allocation7 + $0x28] sm:$0xff]  ;;  %v95_v16 = vld [vmem:[#allocation7 + $0x38] sm:$0xff]  ;;  %v92_v18 = vld [vmem:[#allocation7 + $0x20] sm:$0xff] }
  0x52   :  { %327 = vmatpush1.msra.mxu0 %v4021_v4  ;;  %390 = vmatprep.mubr.f32.mxu0 %v3911_v1  ;;  %v90_v19 = vld [vmem:[#allocation7 + $0x10] sm:$0xff]  ;;  %v97_v21 = vld [vmem:[#allocation7 + $0x48] sm:$0xff]  ;;  %v4079_v22 = vpack.c.bf16 %v93_v14, %v89_v13  ;;  %v4081_v23 = vpack.c.bf16 %v95_v16, %v91_v15  ;;  %v99_v25 = vld [vmem:[#allocation7 + $0x58] sm:$0xff]  ;;  %v4087_v28 = vpack.c.bf16 %v92_v18, %v88_v17 }
  0x53   :  { %398 = vmatpush1.msra.mxu1 %v4025_v5  ;;  %461 = vmatprep.mubr.f32.mxu1 %v3911_v1  ;;  %v94_v20 = vld [vmem:[#allocation7 + $0x30] sm:$0xff]  ;;  %v101_v24 = vld [vmem:[#allocation7 + $0x68] sm:$0xff]  ;;  %v103_v26 = vld [vmem:[#allocation7 + $0x78] sm:$0xff] }
  0x54   :  { %2993 = vmatmul.mubr.msk.f32.vlgmr.msra.gmra.mrb[2].mxu0 %vm175_vm0, %v322_v7  ;;  %2994 = vmatmul.mubr.msk.f32.vlgmr.msra.gmra.mrb[2].mxu1 %vm175_vm0, %v322_v7  ;;  %v1204_v27 = vld [vmem:[#allocation3 + $0x38] sm:$0xff]  ;;  %v4089_v29 = vpack.c.bf16 %v94_v20, %v90_v19  ;;  %v96_v30 = vld [vmem:[#allocation7 + $0x40] sm:$0xff]  ;;  %v4093_v32 = vpack.c.bf16 %v101_v24, %v97_v21  ;;  %v4095_v33 = vpack.c.bf16 %v103_v26, %v99_v25  ;;  %v98_v34 = vld [vmem:[#allocation7 + $0x50] sm:$0xff] }
  0x55   :  { %473 = vmatprep.subr.mxu0 %v4017_v2  ;;  %544 = vmatprep.subr.mxu1 %v4019_v3  ;;  %v100_v31 = vld [vmem:[#allocation7 + $0x60] sm:$0xff]  ;;  %v102_v35 = vld [vmem:[#allocation7 + $0x70] sm:$0xff]  ;;  %v105_v36 = vld [vmem:[#allocation7 + $0x88] sm:$0xff] }
  0x56   :  { %474 = vmatpush1.msra.mxu0 %v4021_v4  ;;  %537 = vmatprep.mubr.f32.mxu0 %v3911_v1  ;;  %v109_v37 = vld [vmem:[#allocation7 + $0xa8] sm:$0xff]  ;;  %v107_v38 = vld [vmem:[#allocation7 + $0x98] sm:$0xff]  ;;  %v4103_v40 = vpack.c.bf16 %v100_v31, %v96_v30  ;;  %v4105_v41 = vpack.c.bf16 %v102_v35, %v98_v34  ;;  %v104_v42 = vld [vmem:[#allocation7 + $0x80] sm:$0xff] }
  0x57   :  { %545 = vmatpush1.msra.mxu1 %v4025_v5  ;;  %608 = vmatprep.mubr.f32.mxu1 %v3911_v1  ;;  %v111_v39 = vld [vmem:[#allocation7 + $0xb8] sm:$0xff]  ;;  %v108_v43 = vld [vmem:[#allocation7 + $0xa0] sm:$0xff]  ;;  %v4109_v44 = vpack.c.bf16 %v109_v37, %v105_v36  ;;  %v106_v46 = vld [vmem:[#allocation7 + $0x90] sm:$0xff] }
  0x58   :  { %2995 = vmatmul.mubr.msk.f32.vlgmr.msra.gmra.mrb[4].mxu0 %vm175_vm0, %v469_v8  ;;  %2996 = vmatmul.mubr.msk.f32.vlgmr.msra.gmra.mrb[4].mxu1 %vm175_vm0, %v469_v8  ;;  %v4111_v45 = vpack.c.bf16 %v111_v39, %v107_v38  ;;  %v110_v47 = vld [vmem:[#allocation7 + $0xb0] sm:$0xff]  ;;  %v113_v48 = vld [vmem:[#allocation7 + $0xc8] sm:$0xff]  ;;  %v115_v50 = vld [vmem:[#allocation7 + $0xd8] sm:$0xff]  ;;  %v4117_v52 = vpack.c.bf16 %v108_v43, %v104_v42 }
  0x59   :  { %620 = vmatprep.subr.mxu0 %v4017_v2  ;;  %691 = vmatprep.subr.mxu1 %v4019_v3  ;;  %v117_v49 = vld [vmem:[#allocation7 + $0xe8] sm:$0xff]  ;;  %v119_v51 = vld [vmem:[#allocation7 + $0xf8] sm:$0xff]  ;;  %v4119_v53 = vpack.c.bf16 %v110_v47, %v106_v46  ;;  %v112_v54 = vld [vmem:[#allocation7 + $0xc0] sm:$0xff] }
  0x5a   :  { %621 = vmatpush1.msra.mxu0 %v4021_v4  ;;  %684 = vmatprep.mubr.f32.mxu0 %v3911_v1  ;;  %v116_v55 = vld [vmem:[#allocation7 + $0xe0] sm:$0xff]  ;;  %v4123_v56 = vpack.c.bf16 %v117_v49, %v113_v48  ;;  %v4125_v57 = vpack.c.bf16 %v119_v51, %v115_v50  ;;  %v114_v58 = vld [vmem:[#allocation7 + $0xd0] sm:$0xff]  ;;  %v121_v60 = vld [vmem:[#allocation7 + $0x108] sm:$0xff] }
  0x5b   :  { %692 = vmatpush1.msra.mxu1 %v4025_v5  ;;  %755 = vmatprep.mubr.f32.mxu1 %v3911_v1  ;;  %v118_v59 = vld [vmem:[#allocation7 + $0xf0] sm:$0xff]  ;;  %v125_v61 = vld [vmem:[#allocation7 + $0x128] sm:$0xff]  ;;  %v123_v62 = vld [vmem:[#allocation7 + $0x118] sm:$0xff]  ;;  %v4129_v0 = vpack.c.bf16 %v116_v55, %v112_v54 }
  0x5c   :  { %2997 = vmatmul.mubr.msk.f32.vlgmr.msra.gmra.mrb[6].mxu0 %vm175_vm0, %v616_v9  ;;  %2998 = vmatmul.mubr.msk.f32.vlgmr.msra.gmra.mrb[6].mxu1 %vm175_vm0, %v616_v9  ;;  %v127_v63 = vld [vmem:[#allocation7 + $0x138] sm:$0xff]  ;;  %v122_v7 = vld [vmem:[#allocation7 + $0x110] sm:$0xff]  ;;  %v129_v9 = vld [vmem:[#allocation7 + $0x148] sm:$0xff] }
  0x5d   :  { %767 = vmatprep.subr.mxu0 %v4017_v2  ;;  %838 = vmatprep.subr.mxu1 %v4019_v3  ;;  %v4137_v6 = vpack.c.bf16 %v127_v63, %v123_v62  ;;  %v126_v8 = vld [vmem:[#allocation7 + $0x130] sm:$0xff]  ;;  %v128_v15 = vld [vmem:[#allocation7 + $0x140] sm:$0xff]  ;;  %v137_v21 = vld [vmem:[#allocation7 + $0x188] sm:$0xff] }
  0x5e   :  { %768 = vmatpush1.msra.mxu0 %v4021_v4  ;;  %831 = vmatprep.mubr.f32.mxu0 %v3911_v1  ;;  %v4143_v14 = vpack.c.bf16 %v126_v8, %v122_v7  ;;  %v132_v16 = vld [vmem:[#allocation7 + $0x160] sm:$0xff]  ;;  %v130_v19 = vld [vmem:[#allocation7 + $0x150] sm:$0xff]  ;;  %v141_v24 = vld [vmem:[#allocation7 + $0x1a8] sm:$0xff] }
  0x5f   :  { %839 = vmatpush1.msra.mxu1 %v4025_v5  ;;  %902 = vmatprep.mubr.f32.mxu1 %v3911_v1  ;;  %v134_v20 = vld [vmem:[#allocation7 + $0x170] sm:$0xff]  ;;  %v139_v25 = vld [vmem:[#allocation7 + $0x198] sm:$0xff]  ;;  %v136_v31 = vld [vmem:[#allocation7 + $0x180] sm:$0xff]  ;;  %v4159_v35 = vpack.c.bf16 %v141_v24, %v137_v21 }
  0x60   :  { %2999 = vmatmul.mubr.msk.f32.vlgmr.msra.gmra.mrb[8].mxu0 %vm175_vm0, %v763_v10  ;;  %3000 = vmatmul.mubr.msk.f32.vlgmr.msra.gmra.mrb[8].mxu1 %vm175_vm0, %v763_v10  ;;  %v133_v10 = vld [vmem:[#allocation7 + $0x168] sm:$0xff]  ;;  %v143_v26 = vld [vmem:[#allocation7 + $0x1b8] sm:$0xff]  ;;  %v4155_v30 = vpack.c.bf16 %v134_v20, %v130_v19  ;;  %v140_v34 = vld [vmem:[#allocation7 + $0x1a0] sm:$0xff] }
  0x61   :  { %914 = vmatprep.subr.mxu0 %v4017_v2  ;;  %985 = vmatprep.subr.mxu1 %v4019_v3  ;;  %v4147_v17 = vpack.c.bf16 %v133_v10, %v129_v9  ;;  %v4161_v36 = vpack.c.bf16 %v143_v26, %v139_v25  ;;  %v138_v37 = vld [vmem:[#allocation7 + $0x190] sm:$0xff]  ;;  %v145_v39 = vld [vmem:[#allocation7 + $0x1c8] sm:$0xff]  ;;  %v147_v43 = vld [vmem:[#allocation7 + $0x1d8] sm:$0xff]  ;;  %v4165_v47 = vpack.c.bf16 %v140_v34, %v136_v31 }
  0x62   :  { %915 = vmatpush1.msra.mxu0 %v4021_v4  ;;  %978 = vmatprep.mubr.f32.mxu0 %v3911_v1  ;;  %v142_v38 = vld [vmem:[#allocation7 + $0x1b0] sm:$0xff]  ;;  %v149_v42 = vld [vmem:[#allocation7 + $0x1e8] sm:$0xff]  ;;  %v151_v46 = vld [vmem:[#allocation7 + $0x1f8] sm:$0xff] }
  0x63   :  { %986 = vmatpush1.msra.mxu1 %v4025_v5  ;;  %1049 = vmatprep.mubr.f32.mxu1 %v3911_v1  ;;  %v4167_v48 = vpack.c.bf16 %v142_v38, %v138_v37  ;;  %v144_v49 = vld [vmem:[#allocation7 + $0x1c0] sm:$0xff]  ;;  %v4171_v50 = vpack.c.bf16 %v149_v42, %v145_v39  ;;  %v4173_v51 = vpack.c.bf16 %v151_v46, %v147_v43  ;;  %v146_v55 = vld [vmem:[#allocation7 + $0x1d0] sm:$0xff] }
  0x64   :  { %3001 = vmatmul.mubr.msk.f32.vlgmr.msra.gmra.mrb[10].mxu0 %vm175_vm0, %v910_v11  ;;  %3002 = vmatmul.mubr.msk.f32.vlgmr.msra.gmra.mrb[10].mxu1 %vm175_vm0, %v910_v11  ;;  %v131_v11 = vld [vmem:[#allocation7 + $0x158] sm:$0xff]  ;;  %v148_v54 = vld [vmem:[#allocation7 + $0x1e0] sm:$0xff] }
  0x65   :  { %1061 = vmatprep.subr.mxu0 %v4017_v2  ;;  %1132 = vmatprep.subr.mxu1 %v4019_v3 }
  0x66   :  { %1062 = vmatpush1.msra.mxu0 %v4021_v4  ;;  %1125 = vmatprep.mubr.f32.mxu0 %v3911_v1 }
  0x67   :  { %1133 = vmatpush1.msra.mxu1 %v4025_v5  ;;  %1196 = vmatprep.mubr.f32.mxu1 %v3911_v1 }
  0x68   :  { %3003 = vmatmul.mubr.msk.f32.vlgmr.msra.gmra.mrb[12].mxu0 %vm175_vm0, %v1057_v12  ;;  %3004 = vmatmul.mubr.msk.f32.vlgmr.msra.gmra.mrb[12].mxu1 %vm175_vm0, %v1057_v12  ;;  %v135_v12 = vld [vmem:[#allocation7 + $0x178] sm:$0xff] }
  0x69   :  { %1208 = vmatprep.subr.mxu0 %v4017_v2  ;;  %1279 = vmatprep.subr.mxu1 %v4019_v3  ;;  %v4131_v2 = vpack.c.bf16 %v118_v59, %v114_v58  ;;  %v120_v3 = vld [vmem:[#allocation7 + $0x100] sm:$0xff]  ;;  %v4149_v18 = vpack.c.bf16 %v135_v12, %v131_v11  ;;  %v150_v58 = vld [vmem:[#allocation7 + $0x1f0] sm:$0xff]  ;;  %v4177_v59 = vpack.c.bf16 %v148_v54, %v144_v49 }
  0x6a   :  { %1209 = vmatpush1.msra.mxu0 %v4021_v4  ;;  %1280 = vmatpush1.msra.mxu1 %v4025_v5  ;;  %v124_v4 = vld [vmem:[#allocation7 + $0x120] sm:$0xff]  ;;  %v4135_v5 = vpack.c.bf16 %v125_v61, %v121_v60  ;;  %v4179_v60 = vpack.c.bf16 %v150_v58, %v146_v55  ;;  %v155_v61 = vlaneseq }
  0x6b   :  { %1272 = vmatprep.mubr.f32.mxu0 %v3911_v1  ;;  %1343 = vmatprep.mubr.f32.mxu1 %v3911_v1  ;;  %v4141_v13 = vpack.c.bf16 %v124_v4, %v120_v3  ;;  %v152_v3 = vld [vmem:[%s4530_s3] sm:$0xf] }
  0x6c   :  { %3033 = vmatprep.subr.bf16.mxu0 %v4079_v22  ;;  %3065 = vmatprep.subr.bf16.mxu1 %v4081_v23  ;;  %v156_v62 = vshrl.u32 %v155_v61, 7 }
  0x6d   :  { %3005 = vmatmul.mubr.msk.f32.vlgmr.msra.gmra.mrb[14].mxu0 %vm175_vm0, %v1204_v27  ;;  %3006 = vmatmul.mubr.msk.f32.vlgmr.msra.gmra.mrb[14].mxu1 %vm175_vm0, %v1204_v27  ;;  %v4153_v27 = vpack.c.bf16 %v132_v16, %v128_v15 }
  0x6e   :  { %3035 = vmatpush1.bf16.msra.mxu0 %v4087_v28  ;;  %3067 = vmatpush1.bf16.msra.mxu1 %v4089_v29  ;;  %v4223_v63 = vsub.s32 0, %v156_v62  ;;  %v4228_v4 = vsub.s32 1, %v156_v62  ;;  %v4236_v11 = vsub.s32 3, %v156_v62  ;;  %v4243_v25 = vsub.s32 2, %v156_v62 }
  0x6f   :  { %3037 = vmatprep.subr.bf16.mxu0 %v4093_v32  ;;  %3069 = vmatprep.subr.bf16.mxu1 %v4095_v33 }
  0x70   :  { %1414 = vmatprep.mubr.f32.mxu0 %v3911_v1  ;;  %1485 = vmatprep.mubr.f32.mxu1 %v3911_v1  ;;  %v4231_v7 = vrot.slane %v152_v3, %v4223_v63  ;;  %v4234_v8 = vrot.slane %v152_v3, %v4228_v4  ;;  %v4241_v24 = vrot.slane %v152_v3, %v4236_v11 }
  0x71   :  { %v4247_v31 = vrot.slane %v152_v3, %v4243_v25 }
  0x72   :  { %3039 = vmatpush1.bf16.msra.mxu0 %v4103_v40  ;;  %3071 = vmatpush1.bf16.msra.mxu1 %v4105_v41 }
  0x73   :  { %3041 = vmatprep.subr.bf16.mxu0 %v4109_v44  ;;  %3073 = vmatprep.subr.bf16.mxu1 %v4111_v45 }
  0x76   :  { %3043 = vmatpush1.bf16.msra.mxu0 %v4117_v52  ;;  %3075 = vmatpush1.bf16.msra.mxu1 %v4119_v53 }
  0x77   :  { %3045 = vmatprep.subr.bf16.mxu0 %v4123_v56  ;;  %3077 = vmatprep.subr.bf16.mxu1 %v4125_v57 }
  0x7a   :  { %3047 = vmatpush1.bf16.msra.mxu0 %v4129_v0  ;;  %3079 = vmatpush1.bf16.msra.mxu1 %v4131_v2 }
  0x7b   :  { %3049 = vmatprep.subr.bf16.mxu0 %v4135_v5  ;;  %3081 = vmatprep.subr.bf16.mxu1 %v4137_v6 }
  0x7e   :  { %3051 = vmatpush1.bf16.msra.mxu0 %v4141_v13  ;;  %3083 = vmatpush1.bf16.msra.mxu1 %v4143_v14 }
  0x7f   :  { %3053 = vmatprep.subr.bf16.mxu0 %v4147_v17  ;;  %3085 = vmatprep.subr.bf16.mxu1 %v4149_v18 }
  0x82   :  { %3055 = vmatpush1.bf16.msra.mxu0 %v4153_v27  ;;  %3087 = vmatpush1.bf16.msra.mxu1 %v4155_v30 }
  0x83   :  { %3057 = vmatprep.subr.bf16.mxu0 %v4159_v35  ;;  %3089 = vmatprep.subr.bf16.mxu1 %v4161_v36 }
  0x86   :  { %3059 = vmatpush1.bf16.msra.mxu0 %v4165_v47  ;;  %3091 = vmatpush1.bf16.msra.mxu1 %v4167_v48 }
  0x87   :  { %3061 = vmatprep.subr.bf16.mxu0 %v4171_v50  ;;  %3093 = vmatprep.subr.bf16.mxu1 %v4173_v51 }
  0x8a   :  { %3063 = vmatpush1.bf16.msra.mxu0 %v4177_v59  ;;  %3095 = vmatpush1.bf16.msra.mxu1 %v4179_v60 }
  0x8b   :  { %3097 = vmatprep.subr.bf16.mxu0 %v4079_v22  ;;  %3129 = vmatprep.subr.bf16.mxu1 %v4081_v23 }
  0x8d   :  { %1415 = vmatmul.mubr.f32.vlgmr.msra.gmra.mrb[0].mxu0 %v3911_v1  ;;  %1486 = vmatmul.mubr.f32.vlgmr.msra.gmra.mrb[0].mxu1 %v3911_v1 }
  0x8e   :  { %3099 = vmatpush1.bf16.msra.mxu0 %v4087_v28  ;;  %3131 = vmatpush1.bf16.msra.mxu1 %v4089_v29 }
  0x8f   :  { %3101 = vmatprep.subr.bf16.mxu0 %v4093_v32  ;;  %3133 = vmatprep.subr.bf16.mxu1 %v4095_v33 }
  0x90   :  { %1584 = vmatprep.mubr.f32.mxu0 %v3911_v1  ;;  %1655 = vmatprep.mubr.f32.mxu1 %v3911_v1 }
  0x92   :  { %3103 = vmatpush1.bf16.msra.mxu0 %v4103_v40  ;;  %3135 = vmatpush1.bf16.msra.mxu1 %v4105_v41 }
  0x93   :  { %3105 = vmatprep.subr.bf16.mxu0 %v4109_v44  ;;  %3137 = vmatprep.subr.bf16.mxu1 %v4111_v45 }
  0x96   :  { %3107 = vmatpush1.bf16.msra.mxu0 %v4117_v52  ;;  %3139 = vmatpush1.bf16.msra.mxu1 %v4119_v53 }
  0x97   :  { %3109 = vmatprep.subr.bf16.mxu0 %v4123_v56  ;;  %3141 = vmatprep.subr.bf16.mxu1 %v4125_v57 }
  0x9a   :  { %3111 = vmatpush1.bf16.msra.mxu0 %v4129_v0  ;;  %3143 = vmatpush1.bf16.msra.mxu1 %v4131_v2 }
  0x9b   :  { %3113 = vmatprep.subr.bf16.mxu0 %v4135_v5  ;;  %3145 = vmatprep.subr.bf16.mxu1 %v4137_v6 }
  0x9e   :  { %3115 = vmatpush1.bf16.msra.mxu0 %v4141_v13  ;;  %3147 = vmatpush1.bf16.msra.mxu1 %v4143_v14 }
  0x9f   :  { %3117 = vmatprep.subr.bf16.mxu0 %v4147_v17  ;;  %3149 = vmatprep.subr.bf16.mxu1 %v4149_v18 }
  0xa2   :  { %3119 = vmatpush1.bf16.msra.mxu0 %v4153_v27  ;;  %3151 = vmatpush1.bf16.msra.mxu1 %v4155_v30 }
  0xa3   :  { %3121 = vmatprep.subr.bf16.mxu0 %v4159_v35  ;;  %3153 = vmatprep.subr.bf16.mxu1 %v4161_v36 }
  0xa6   :  { %3123 = vmatpush1.bf16.msra.mxu0 %v4165_v47  ;;  %3155 = vmatpush1.bf16.msra.mxu1 %v4167_v48 }
  0xa7   :  { %3125 = vmatprep.subr.bf16.mxu0 %v4171_v50  ;;  %3157 = vmatprep.subr.bf16.mxu1 %v4173_v51 }
  0xaa   :  { %3127 = vmatpush1.bf16.msra.mxu0 %v4177_v59  ;;  %3159 = vmatpush1.bf16.msra.mxu1 %v4179_v60 }
  0xab   :  { %3161 = vmatprep.subr.bf16.mxu0 %v4079_v22  ;;  %3193 = vmatprep.subr.bf16.mxu1 %v4081_v23 }
 0x160   :  { %v1416_v9 = vpop.f32.mrb[0].mxu0  ;;  %v1487_v10 = vpop.f32.mrb[0].mxu1 }
 0x161   :  { %v3608_v12 = vadd.f32 %v1416_v9, %v4231_v7  ;;  %v1418_v15 = vpop.f32.mrb[1].mxu0  ;;  %v1489_v16 = vpop.f32.mrb[1].mxu1  ;;  %v3610_v37 = vadd.f32 %v1487_v10, %v4247_v31 }
 0x162   :  { %v3609_v19 = vadd.f32 %v1418_v15, %v4234_v8  ;;  %v3611_v26 = vadd.f32 %v1489_v16, %v4241_v24 }
 0x163   :  { %v3007_v20 = vmul.f32 -1.442695, %v3608_v12 }
 0x164   :  { %v3008_v21 = vmul.f32 -1.442695, %v3609_v19  ;;  %v3009_v34 = vmul.f32 -1.442695, %v3611_v26 }
 0x165   :  { %3681 = vpow2.f32 %v3007_v20 }
 0x166   :  { %3683 = vpow2.f32 %v3008_v21 }
 0x167   :  { %3685 = vpow2.f32 %v3009_v34 }
 0x168   :  { %3687 = vtanh.f32 %v3610_v37 }
 0x16f   :  { %v3682_v38 = vpop.eup %3681 }
 0x170   :  { %v3684_v39 = vpop.eup %3683  ;;  %v1499_v42 = vadd.f32 1.0, %v3682_v38 }
 0x171   :  { %v1505_v43 = vadd.f32 1.0, %v3684_v39  ;;  %v3686_v46 = vpop.eup %3685 }
 0x172   :  { %3689 = vrcp.f32 %v1499_v42  ;;  %v3688_v49 = vpop.eup %3687  ;;  %v1512_v61 = vadd.f32 1.0, %v3686_v46 }
 0x173   :  { %3691 = vrcp.f32 %v1505_v43 }
 0x174   :  { %3693 = vrcp.f32 %v1512_v61 }
 0x17c   :  { %v3690_v54 = vpop.eup %3689 }
 0x17d   :  { %v3692_v55 = vpop.eup %3691  ;;  %v1516_v58 = vmul.f32 %v3690_v54, %v3688_v49 }
 0x17e   :  { %v1515_v62 = vmul.f32 0.0, %v3692_v55  ;;  %v3694_v9 = vpop.eup %3693 }
 0x180   :  { %v4250_v3 = vadd.f32 %v1516_v58, %v1515_v62 }
 0x182   :  { %3695 = vtanh.f32 %v4250_v3 }
 0x18c   :  { %v3696_v10 = vpop.eup %3695 }
 0x18d   :  { %v1519_v12 = vmul.f32 %v3696_v10, %v3694_v9 }
 0x18f   :  { %1585 = vmatmul.mubr.f32.vlgmr.msra.gmra.mrb[2].mxu0 %v1519_v12  ;;  %1656 = vmatmul.mubr.f32.vlgmr.msra.gmra.mrb[2].mxu1 %v1519_v12 }
 0x190   :  { %3163 = vmatpush1.bf16.msra.mxu0 %v4087_v28  ;;  %3195 = vmatpush1.bf16.msra.mxu1 %v4089_v29 }
 0x191   :  { %3165 = vmatprep.subr.bf16.mxu0 %v4093_v32  ;;  %3197 = vmatprep.subr.bf16.mxu1 %v4095_v33 }
 0x192   :  { %1754 = vmatprep.mubr.f32.mxu0 %v3911_v1  ;;  %1825 = vmatprep.mubr.f32.mxu1 %v3911_v1 }
 0x194   :  { %3167 = vmatpush1.bf16.msra.mxu0 %v4103_v40  ;;  %3199 = vmatpush1.bf16.msra.mxu1 %v4105_v41 }
 0x195   :  { %3169 = vmatprep.subr.bf16.mxu0 %v4109_v44  ;;  %3201 = vmatprep.subr.bf16.mxu1 %v4111_v45 }
 0x198   :  { %3171 = vmatpush1.bf16.msra.mxu0 %v4117_v52  ;;  %3203 = vmatpush1.bf16.msra.mxu1 %v4119_v53 }
 0x199   :  { %3173 = vmatprep.subr.bf16.mxu0 %v4123_v56  ;;  %3205 = vmatprep.subr.bf16.mxu1 %v4125_v57 }
 0x19c   :  { %3175 = vmatpush1.bf16.msra.mxu0 %v4129_v0  ;;  %3207 = vmatpush1.bf16.msra.mxu1 %v4131_v2 }
 0x19d   :  { %3177 = vmatprep.subr.bf16.mxu0 %v4135_v5  ;;  %3209 = vmatprep.subr.bf16.mxu1 %v4137_v6 }
 0x1a0   :  { %3179 = vmatpush1.bf16.msra.mxu0 %v4141_v13  ;;  %3211 = vmatpush1.bf16.msra.mxu1 %v4143_v14 }
 0x1a1   :  { %3181 = vmatprep.subr.bf16.mxu0 %v4147_v17  ;;  %3213 = vmatprep.subr.bf16.mxu1 %v4149_v18 }
 0x1a4   :  { %3183 = vmatpush1.bf16.msra.mxu0 %v4153_v27  ;;  %3215 = vmatpush1.bf16.msra.mxu1 %v4155_v30 }
 0x1a5   :  { %3185 = vmatprep.subr.bf16.mxu0 %v4159_v35  ;;  %3217 = vmatprep.subr.bf16.mxu1 %v4161_v36 }
 0x1a8   :  { %3187 = vmatpush1.bf16.msra.mxu0 %v4165_v47  ;;  %3219 = vmatpush1.bf16.msra.mxu1 %v4167_v48 }
 0x1a9   :  { %3189 = vmatprep.subr.bf16.mxu0 %v4171_v50  ;;  %3221 = vmatprep.subr.bf16.mxu1 %v4173_v51 }
 0x1ac   :  { %3191 = vmatpush1.bf16.msra.mxu0 %v4177_v59  ;;  %3223 = vmatpush1.bf16.msra.mxu1 %v4179_v60 }
 0x1ad   :  { %3225 = vmatprep.subr.bf16.mxu0 %v4079_v22  ;;  %3257 = vmatprep.subr.bf16.mxu1 %v4081_v23 }
 0x262   :  { %v1586_v15 = vpop.f32.mrb[2].mxu0  ;;  %v1657_v16 = vpop.f32.mrb[2].mxu1 }
 0x263   :  { %v3612_v19 = vadd.f32 %v1586_v15, %v4231_v7  ;;  %v1588_v20 = vpop.f32.mrb[3].mxu0  ;;  %v1659_v21 = vpop.f32.mrb[3].mxu1  ;;  %v3614_v42 = vadd.f32 %v1657_v16, %v4247_v31 }
 0x264   :  { %v3613_v26 = vadd.f32 %v1588_v20, %v4234_v8  ;;  %v3615_v38 = vadd.f32 %v1659_v21, %v4241_v24 }
 0x265   :  { %v3010_v34 = vmul.f32 -1.442695, %v3612_v19 }
 0x266   :  { %v3011_v37 = vmul.f32 -1.442695, %v3613_v26  ;;  %v3012_v39 = vmul.f32 -1.442695, %v3615_v38 }
 0x267   :  { %3697 = vpow2.f32 %v3010_v34 }
 0x268   :  { %3699 = vpow2.f32 %v3011_v37 }
 0x269   :  { %3701 = vpow2.f32 %v3012_v39 }
 0x26a   :  { %3703 = vtanh.f32 %v3614_v42 }
 0x271   :  { %v3698_v43 = vpop.eup %3697 }
 0x272   :  { %v3700_v46 = vpop.eup %3699  ;;  %v1669_v49 = vadd.f32 1.0, %v3698_v43 }
 0x273   :  { %v1675_v54 = vadd.f32 1.0, %v3700_v46  ;;  %v3702_v55 = vpop.eup %3701 }
 0x274   :  { %3705 = vrcp.f32 %v1669_v49  ;;  %v3704_v58 = vpop.eup %3703  ;;  %v1682_v10 = vadd.f32 1.0, %v3702_v55 }
 0x275   :  { %3707 = vrcp.f32 %v1675_v54 }
 0x276   :  { %3709 = vrcp.f32 %v1682_v10 }
 0x27e   :  { %v3706_v61 = vpop.eup %3705 }
 0x27f   :  { %v3708_v62 = vpop.eup %3707  ;;  %v1686_v9 = vmul.f32 %v3706_v61, %v3704_v58 }
 0x280   :  { %v1685_v12 = vmul.f32 %v3708_v62, %v4250_v3  ;;  %v3710_v16 = vpop.eup %3709 }
 0x282   :  { %v4292_v15 = vadd.f32 %v1686_v9, %v1685_v12 }
 0x284   :  { %3711 = vtanh.f32 %v4292_v15 }
 0x28e   :  { %v3712_v19 = vpop.eup %3711 }
 0x28f   :  { %v1689_v20 = vmul.f32 %v3712_v19, %v3710_v16 }
 0x291   :  { %1755 = vmatmul.mubr.f32.vlgmr.msra.gmra.mrb[4].mxu0 %v1689_v20  ;;  %1826 = vmatmul.mubr.f32.vlgmr.msra.gmra.mrb[4].mxu1 %v1689_v20 }
 0x292   :  { %3227 = vmatpush1.bf16.msra.mxu0 %v4087_v28  ;;  %3259 = vmatpush1.bf16.msra.mxu1 %v4089_v29 }
 0x293   :  { %3229 = vmatprep.subr.bf16.mxu0 %v4093_v32  ;;  %3261 = vmatprep.subr.bf16.mxu1 %v4095_v33 }
 0x294   :  { %1924 = vmatprep.mubr.f32.mxu0 %v3911_v1  ;;  %1995 = vmatprep.mubr.f32.mxu1 %v3911_v1 }
 0x296   :  { %3231 = vmatpush1.bf16.msra.mxu0 %v4103_v40  ;;  %3263 = vmatpush1.bf16.msra.mxu1 %v4105_v41 }
 0x297   :  { %3233 = vmatprep.subr.bf16.mxu0 %v4109_v44  ;;  %3265 = vmatprep.subr.bf16.mxu1 %v4111_v45 }
 0x29a   :  { %3235 = vmatpush1.bf16.msra.mxu0 %v4117_v52  ;;  %3267 = vmatpush1.bf16.msra.mxu1 %v4119_v53 }
 0x29b   :  { %3237 = vmatprep.subr.bf16.mxu0 %v4123_v56  ;;  %3269 = vmatprep.subr.bf16.mxu1 %v4125_v57 }
 0x29e   :  { %3239 = vmatpush1.bf16.msra.mxu0 %v4129_v0  ;;  %3271 = vmatpush1.bf16.msra.mxu1 %v4131_v2 }
 0x29f   :  { %3241 = vmatprep.subr.bf16.mxu0 %v4135_v5  ;;  %3273 = vmatprep.subr.bf16.mxu1 %v4137_v6 }
 0x2a2   :  { %3243 = vmatpush1.bf16.msra.mxu0 %v4141_v13  ;;  %3275 = vmatpush1.bf16.msra.mxu1 %v4143_v14 }
 0x2a3   :  { %3245 = vmatprep.subr.bf16.mxu0 %v4147_v17  ;;  %3277 = vmatprep.subr.bf16.mxu1 %v4149_v18 }
 0x2a6   :  { %3247 = vmatpush1.bf16.msra.mxu0 %v4153_v27  ;;  %3279 = vmatpush1.bf16.msra.mxu1 %v4155_v30 }
 0x2a7   :  { %3249 = vmatprep.subr.bf16.mxu0 %v4159_v35  ;;  %3281 = vmatprep.subr.bf16.mxu1 %v4161_v36 }
 0x2aa   :  { %3251 = vmatpush1.bf16.msra.mxu0 %v4165_v47  ;;  %3283 = vmatpush1.bf16.msra.mxu1 %v4167_v48 }
 0x2ab   :  { %3253 = vmatprep.subr.bf16.mxu0 %v4171_v50  ;;  %3285 = vmatprep.subr.bf16.mxu1 %v4173_v51 }
 0x2ae   :  { %3255 = vmatpush1.bf16.msra.mxu0 %v4177_v59  ;;  %3287 = vmatpush1.bf16.msra.mxu1 %v4179_v60 }
 0x2af   :  { %3289 = vmatprep.subr.bf16.mxu0 %v4079_v22  ;;  %3321 = vmatprep.subr.bf16.mxu1 %v4081_v23 }
 0x364   :  { %v1756_v3 = vpop.f32.mrb[4].mxu0  ;;  %v1827_v21 = vpop.f32.mrb[4].mxu1 }
 0x365   :  { %v3616_v26 = vadd.f32 %v1756_v3, %v4231_v7  ;;  %v1758_v34 = vpop.f32.mrb[5].mxu0  ;;  %v1829_v37 = vpop.f32.mrb[5].mxu1  ;;  %v3618_v49 = vadd.f32 %v1827_v21, %v4247_v31 }
 0x366   :  { %v3617_v38 = vadd.f32 %v1758_v34, %v4234_v8  ;;  %v3619_v43 = vadd.f32 %v1829_v37, %v4241_v24 }
 0x367   :  { %v3013_v39 = vmul.f32 -1.442695, %v3616_v26 }
 0x368   :  { %v3014_v42 = vmul.f32 -1.442695, %v3617_v38  ;;  %v3015_v46 = vmul.f32 -1.442695, %v3619_v43 }
 0x369   :  { %3713 = vpow2.f32 %v3013_v39 }
 0x36a   :  { %3715 = vpow2.f32 %v3014_v42 }
 0x36b   :  { %3717 = vpow2.f32 %v3015_v46 }
 0x36c   :  { %3719 = vtanh.f32 %v3618_v49 }
 0x373   :  { %v3714_v54 = vpop.eup %3713 }
 0x374   :  { %v3716_v55 = vpop.eup %3715  ;;  %v1839_v58 = vadd.f32 1.0, %v3714_v54 }
 0x375   :  { %v1845_v61 = vadd.f32 1.0, %v3716_v55  ;;  %v3718_v62 = vpop.eup %3717 }
 0x376   :  { %3721 = vrcp.f32 %v1839_v58  ;;  %v3720_v9 = vpop.eup %3719  ;;  %v1852_v19 = vadd.f32 1.0, %v3718_v62 }
 0x377   :  { %3723 = vrcp.f32 %v1845_v61 }
 0x378   :  { %3725 = vrcp.f32 %v1852_v19 }
 0x380   :  { %v3722_v10 = vpop.eup %3721 }
 0x381   :  { %v3724_v12 = vpop.eup %3723  ;;  %v1856_v16 = vmul.f32 %v3722_v10, %v3720_v9 }
 0x382   :  { %v1855_v20 = vmul.f32 %v3724_v12, %v4292_v15  ;;  %v3726_v21 = vpop.eup %3725 }
 0x384   :  { %v4334_v3 = vadd.f32 %v1856_v16, %v1855_v20 }
 0x386   :  { %3727 = vtanh.f32 %v4334_v3 }
 0x390   :  { %v3728_v26 = vpop.eup %3727 }
 0x391   :  { %v1859_v34 = vmul.f32 %v3728_v26, %v3726_v21 }
 0x393   :  { %1925 = vmatmul.mubr.f32.vlgmr.msra.gmra.mrb[6].mxu0 %v1859_v34  ;;  %1996 = vmatmul.mubr.f32.vlgmr.msra.gmra.mrb[6].mxu1 %v1859_v34 }
 0x394   :  { %3291 = vmatpush1.bf16.msra.mxu0 %v4087_v28  ;;  %3323 = vmatpush1.bf16.msra.mxu1 %v4089_v29 }
 0x395   :  { %3293 = vmatprep.subr.bf16.mxu0 %v4093_v32  ;;  %3325 = vmatprep.subr.bf16.mxu1 %v4095_v33 }
 0x396   :  { %2094 = vmatprep.mubr.f32.mxu0 %v3911_v1  ;;  %2165 = vmatprep.mubr.f32.mxu1 %v3911_v1 }
 0x398   :  { %3295 = vmatpush1.bf16.msra.mxu0 %v4103_v40  ;;  %3327 = vmatpush1.bf16.msra.mxu1 %v4105_v41 }
 0x399   :  { %3297 = vmatprep.subr.bf16.mxu0 %v4109_v44  ;;  %3329 = vmatprep.subr.bf16.mxu1 %v4111_v45 }
 0x39c   :  { %3299 = vmatpush1.bf16.msra.mxu0 %v4117_v52  ;;  %3331 = vmatpush1.bf16.msra.mxu1 %v4119_v53 }
 0x39d   :  { %3301 = vmatprep.subr.bf16.mxu0 %v4123_v56  ;;  %3333 = vmatprep.subr.bf16.mxu1 %v4125_v57 }
 0x3a0   :  { %3303 = vmatpush1.bf16.msra.mxu0 %v4129_v0  ;;  %3335 = vmatpush1.bf16.msra.mxu1 %v4131_v2 }
 0x3a1   :  { %3305 = vmatprep.subr.bf16.mxu0 %v4135_v5  ;;  %3337 = vmatprep.subr.bf16.mxu1 %v4137_v6 }
 0x3a4   :  { %3307 = vmatpush1.bf16.msra.mxu0 %v4141_v13  ;;  %3339 = vmatpush1.bf16.msra.mxu1 %v4143_v14 }
 0x3a5   :  { %3309 = vmatprep.subr.bf16.mxu0 %v4147_v17  ;;  %3341 = vmatprep.subr.bf16.mxu1 %v4149_v18 }
 0x3a8   :  { %3311 = vmatpush1.bf16.msra.mxu0 %v4153_v27  ;;  %3343 = vmatpush1.bf16.msra.mxu1 %v4155_v30 }
 0x3a9   :  { %3313 = vmatprep.subr.bf16.mxu0 %v4159_v35  ;;  %3345 = vmatprep.subr.bf16.mxu1 %v4161_v36 }
 0x3ac   :  { %3315 = vmatpush1.bf16.msra.mxu0 %v4165_v47  ;;  %3347 = vmatpush1.bf16.msra.mxu1 %v4167_v48 }
 0x3ad   :  { %3317 = vmatprep.subr.bf16.mxu0 %v4171_v50  ;;  %3349 = vmatprep.subr.bf16.mxu1 %v4173_v51 }
 0x3b0   :  { %3319 = vmatpush1.bf16.msra.mxu0 %v4177_v59  ;;  %3351 = vmatpush1.bf16.msra.mxu1 %v4179_v60 }
 0x3b1   :  { %3353 = vmatprep.subr.bf16.mxu0 %v4079_v22  ;;  %3385 = vmatprep.subr.bf16.mxu1 %v4081_v23 }
 0x466   :  { %v1926_v15 = vpop.f32.mrb[6].mxu0  ;;  %v1997_v37 = vpop.f32.mrb[6].mxu1 }
 0x467   :  { %v3620_v38 = vadd.f32 %v1926_v15, %v4231_v7  ;;  %v1928_v39 = vpop.f32.mrb[7].mxu0  ;;  %v1999_v42 = vpop.f32.mrb[7].mxu1  ;;  %v3622_v58 = vadd.f32 %v1997_v37, %v4247_v31 }
 0x468   :  { %v3621_v43 = vadd.f32 %v1928_v39, %v4234_v8  ;;  %v3623_v54 = vadd.f32 %v1999_v42, %v4241_v24 }
 0x469   :  { %v3016_v46 = vmul.f32 -1.442695, %v3620_v38 }
 0x46a   :  { %v3017_v49 = vmul.f32 -1.442695, %v3621_v43  ;;  %v3018_v55 = vmul.f32 -1.442695, %v3623_v54 }
 0x46b   :  { %3729 = vpow2.f32 %v3016_v46 }
 0x46c   :  { %3731 = vpow2.f32 %v3017_v49 }
 0x46d   :  { %3733 = vpow2.f32 %v3018_v55 }
 0x46e   :  { %3735 = vtanh.f32 %v3622_v58 }
 0x475   :  { %v3730_v61 = vpop.eup %3729 }
 0x476   :  { %v3732_v62 = vpop.eup %3731  ;;  %v2009_v9 = vadd.f32 1.0, %v3730_v61 }
 0x477   :  { %v2015_v10 = vadd.f32 1.0, %v3732_v62  ;;  %v3734_v12 = vpop.eup %3733 }
 0x478   :  { %3737 = vrcp.f32 %v2009_v9  ;;  %v3736_v16 = vpop.eup %3735  ;;  %v2022_v26 = vadd.f32 1.0, %v3734_v12 }
 0x479   :  { %3739 = vrcp.f32 %v2015_v10 }
 0x47a   :  { %3741 = vrcp.f32 %v2022_v26 }
 0x482   :  { %v3738_v19 = vpop.eup %3737 }
 0x483   :  { %v3740_v20 = vpop.eup %3739  ;;  %v2026_v21 = vmul.f32 %v3738_v19, %v3736_v16 }
 0x484   :  { %v2025_v34 = vmul.f32 %v3740_v20, %v4334_v3  ;;  %v3742_v37 = vpop.eup %3741 }
 0x486   :  { %v4376_v15 = vadd.f32 %v2026_v21, %v2025_v34 }
 0x488   :  { %3743 = vtanh.f32 %v4376_v15 }
 0x492   :  { %v3744_v38 = vpop.eup %3743 }
 0x493   :  { %v2029_v39 = vmul.f32 %v3744_v38, %v3742_v37 }
 0x495   :  { %2095 = vmatmul.mubr.f32.vlgmr.msra.gmra.mrb[8].mxu0 %v2029_v39  ;;  %2166 = vmatmul.mubr.f32.vlgmr.msra.gmra.mrb[8].mxu1 %v2029_v39 }
 0x496   :  { %3355 = vmatpush1.bf16.msra.mxu0 %v4087_v28  ;;  %3387 = vmatpush1.bf16.msra.mxu1 %v4089_v29 }
 0x497   :  { %3357 = vmatprep.subr.bf16.mxu0 %v4093_v32  ;;  %3389 = vmatprep.subr.bf16.mxu1 %v4095_v33 }
 0x498   :  { %2264 = vmatprep.mubr.f32.mxu0 %v3911_v1  ;;  %2335 = vmatprep.mubr.f32.mxu1 %v3911_v1 }
 0x49a   :  { %3359 = vmatpush1.bf16.msra.mxu0 %v4103_v40  ;;  %3391 = vmatpush1.bf16.msra.mxu1 %v4105_v41 }
 0x49b   :  { %3361 = vmatprep.subr.bf16.mxu0 %v4109_v44  ;;  %3393 = vmatprep.subr.bf16.mxu1 %v4111_v45 }
 0x49e   :  { %3363 = vmatpush1.bf16.msra.mxu0 %v4117_v52  ;;  %3395 = vmatpush1.bf16.msra.mxu1 %v4119_v53 }
 0x49f   :  { %3365 = vmatprep.subr.bf16.mxu0 %v4123_v56  ;;  %3397 = vmatprep.subr.bf16.mxu1 %v4125_v57 }
 0x4a2   :  { %3367 = vmatpush1.bf16.msra.mxu0 %v4129_v0  ;;  %3399 = vmatpush1.bf16.msra.mxu1 %v4131_v2 }
 0x4a3   :  { %3369 = vmatprep.subr.bf16.mxu0 %v4135_v5  ;;  %3401 = vmatprep.subr.bf16.mxu1 %v4137_v6 }
 0x4a6   :  { %3371 = vmatpush1.bf16.msra.mxu0 %v4141_v13  ;;  %3403 = vmatpush1.bf16.msra.mxu1 %v4143_v14 }
 0x4a7   :  { %3373 = vmatprep.subr.bf16.mxu0 %v4147_v17  ;;  %3405 = vmatprep.subr.bf16.mxu1 %v4149_v18 }
 0x4aa   :  { %3375 = vmatpush1.bf16.msra.mxu0 %v4153_v27  ;;  %3407 = vmatpush1.bf16.msra.mxu1 %v4155_v30 }
 0x4ab   :  { %3377 = vmatprep.subr.bf16.mxu0 %v4159_v35  ;;  %3409 = vmatprep.subr.bf16.mxu1 %v4161_v36 }
 0x4ae   :  { %3379 = vmatpush1.bf16.msra.mxu0 %v4165_v47  ;;  %3411 = vmatpush1.bf16.msra.mxu1 %v4167_v48 }
 0x4af   :  { %3381 = vmatprep.subr.bf16.mxu0 %v4171_v50  ;;  %3413 = vmatprep.subr.bf16.mxu1 %v4173_v51 }
 0x4b2   :  { %3383 = vmatpush1.bf16.msra.mxu0 %v4177_v59  ;;  %3415 = vmatpush1.bf16.msra.mxu1 %v4179_v60 }
 0x4b3   :  { %3417 = vmatprep.subr.bf16.mxu0 %v4079_v22  ;;  %3449 = vmatprep.subr.bf16.mxu1 %v4081_v23 }
 0x568   :  { %v2096_v3 = vpop.f32.mrb[8].mxu0  ;;  %v2167_v42 = vpop.f32.mrb[8].mxu1 }
 0x569   :  { %v3624_v43 = vadd.f32 %v2096_v3, %v4231_v7  ;;  %v2098_v46 = vpop.f32.mrb[9].mxu0  ;;  %v2169_v49 = vpop.f32.mrb[9].mxu1  ;;  %v3626_v9 = vadd.f32 %v2167_v42, %v4247_v31 }
 0x56a   :  { %v3625_v54 = vadd.f32 %v2098_v46, %v4234_v8  ;;  %v3627_v61 = vadd.f32 %v2169_v49, %v4241_v24 }
 0x56b   :  { %v3019_v55 = vmul.f32 -1.442695, %v3624_v43 }
 0x56c   :  { %v3020_v58 = vmul.f32 -1.442695, %v3625_v54  ;;  %v3021_v62 = vmul.f32 -1.442695, %v3627_v61 }
 0x56d   :  { %3745 = vpow2.f32 %v3019_v55 }
 0x56e   :  { %3747 = vpow2.f32 %v3020_v58 }
 0x56f   :  { %3749 = vpow2.f32 %v3021_v62 }
 0x570   :  { %3751 = vtanh.f32 %v3626_v9 }
 0x577   :  { %v3746_v10 = vpop.eup %3745 }
 0x578   :  { %v3748_v12 = vpop.eup %3747  ;;  %v2179_v16 = vadd.f32 1.0, %v3746_v10 }
 0x579   :  { %v2185_v19 = vadd.f32 1.0, %v3748_v12  ;;  %v3750_v20 = vpop.eup %3749 }
 0x57a   :  { %3753 = vrcp.f32 %v2179_v16  ;;  %v3752_v21 = vpop.eup %3751  ;;  %v2192_v38 = vadd.f32 1.0, %v3750_v20 }
 0x57b   :  { %3755 = vrcp.f32 %v2185_v19 }
 0x57c   :  { %3757 = vrcp.f32 %v2192_v38 }
 0x584   :  { %v3754_v26 = vpop.eup %3753 }
 0x585   :  { %v3756_v34 = vpop.eup %3755  ;;  %v2196_v37 = vmul.f32 %v3754_v26, %v3752_v21 }
 0x586   :  { %v2195_v39 = vmul.f32 %v3756_v34, %v4376_v15  ;;  %v3758_v42 = vpop.eup %3757 }
 0x588   :  { %v4418_v3 = vadd.f32 %v2196_v37, %v2195_v39 }
 0x58a   :  { %3759 = vtanh.f32 %v4418_v3 }
 0x594   :  { %v3760_v43 = vpop.eup %3759 }
 0x595   :  { %v2199_v46 = vmul.f32 %v3760_v43, %v3758_v42 }
 0x597   :  { %2265 = vmatmul.mubr.f32.vlgmr.msra.gmra.mrb[10].mxu0 %v2199_v46  ;;  %2336 = vmatmul.mubr.f32.vlgmr.msra.gmra.mrb[10].mxu1 %v2199_v46 }
 0x598   :  { %3419 = vmatpush1.bf16.msra.mxu0 %v4087_v28  ;;  %3451 = vmatpush1.bf16.msra.mxu1 %v4089_v29 }
 0x599   :  { %3421 = vmatprep.subr.bf16.mxu0 %v4093_v32  ;;  %3453 = vmatprep.subr.bf16.mxu1 %v4095_v33 }
 0x59a   :  { %2434 = vmatprep.mubr.f32.mxu0 %v3911_v1  ;;  %2505 = vmatprep.mubr.f32.mxu1 %v3911_v1 }
 0x59c   :  { %3423 = vmatpush1.bf16.msra.mxu0 %v4103_v40  ;;  %3455 = vmatpush1.bf16.msra.mxu1 %v4105_v41 }
 0x59d   :  { %3425 = vmatprep.subr.bf16.mxu0 %v4109_v44  ;;  %3457 = vmatprep.subr.bf16.mxu1 %v4111_v45 }
 0x5a0   :  { %3427 = vmatpush1.bf16.msra.mxu0 %v4117_v52  ;;  %3459 = vmatpush1.bf16.msra.mxu1 %v4119_v53 }
 0x5a1   :  { %3429 = vmatprep.subr.bf16.mxu0 %v4123_v56  ;;  %3461 = vmatprep.subr.bf16.mxu1 %v4125_v57 }
 0x5a4   :  { %3431 = vmatpush1.bf16.msra.mxu0 %v4129_v0  ;;  %3463 = vmatpush1.bf16.msra.mxu1 %v4131_v2 }
 0x5a5   :  { %3433 = vmatprep.subr.bf16.mxu0 %v4135_v5  ;;  %3465 = vmatprep.subr.bf16.mxu1 %v4137_v6 }
 0x5a8   :  { %3435 = vmatpush1.bf16.msra.mxu0 %v4141_v13  ;;  %3467 = vmatpush1.bf16.msra.mxu1 %v4143_v14 }
 0x5a9   :  { %3437 = vmatprep.subr.bf16.mxu0 %v4147_v17  ;;  %3469 = vmatprep.subr.bf16.mxu1 %v4149_v18 }
 0x5ac   :  { %3439 = vmatpush1.bf16.msra.mxu0 %v4153_v27  ;;  %3471 = vmatpush1.bf16.msra.mxu1 %v4155_v30 }
 0x5ad   :  { %3441 = vmatprep.subr.bf16.mxu0 %v4159_v35  ;;  %3473 = vmatprep.subr.bf16.mxu1 %v4161_v36 }
 0x5b0   :  { %3443 = vmatpush1.bf16.msra.mxu0 %v4165_v47  ;;  %3475 = vmatpush1.bf16.msra.mxu1 %v4167_v48 }
 0x5b1   :  { %3445 = vmatprep.subr.bf16.mxu0 %v4171_v50  ;;  %3477 = vmatprep.subr.bf16.mxu1 %v4173_v51 }
 0x5b4   :  { %3447 = vmatpush1.bf16.msra.mxu0 %v4177_v59  ;;  %3479 = vmatpush1.bf16.msra.mxu1 %v4179_v60 }
 0x5b5   :  { %3481 = vmatprep.subr.bf16.mxu0 %v4079_v22  ;;  %3513 = vmatprep.subr.bf16.mxu1 %v4081_v23 }
 0x66a   :  { %v2266_v15 = vpop.f32.mrb[10].mxu0  ;;  %v2337_v49 = vpop.f32.mrb[10].mxu1 }
 0x66b   :  { %v3628_v54 = vadd.f32 %v2266_v15, %v4231_v7  ;;  %v2268_v55 = vpop.f32.mrb[11].mxu0  ;;  %v2339_v58 = vpop.f32.mrb[11].mxu1  ;;  %v3630_v16 = vadd.f32 %v2337_v49, %v4247_v31 }
 0x66c   :  { %v3629_v61 = vadd.f32 %v2268_v55, %v4234_v8  ;;  %v3631_v10 = vadd.f32 %v2339_v58, %v4241_v24  ;;  %v2715_v55 = vld [vmem:[#allocation8 + $0x20] sm:$0xff] }
 0x66d   :  { %v3022_v62 = vmul.f32 -1.442695, %v3628_v54  ;;  %v2711_v54 = vld [vmem:[#allocation8] sm:$0xff] }
 0x66e   :  { %v3023_v9 = vmul.f32 -1.442695, %v3629_v61  ;;  %v3024_v12 = vmul.f32 -1.442695, %v3631_v10  ;;  %v3546_v61 = vpack.c.bf16 %v2715_v55, %v2711_v54  ;;  %v2752_v54 = vld [vmem:[#allocation8 + $0x148] sm:$0xff] }
 0x66f   :  { %3761 = vpow2.f32 %v3022_v62  ;;  %v2713_v62 = vld [vmem:[#allocation8 + $0x10] sm:$0xff]  ;;  %v2756_v55 = vld [vmem:[#allocation8 + $0x168] sm:$0xff] }
 0x670   :  { %3763 = vpow2.f32 %v3023_v9  ;;  %v2717_v9 = vld [vmem:[#allocation8 + $0x30] sm:$0xff] }
 0x671   :  { %3765 = vpow2.f32 %v3024_v12  ;;  %v3578_v10 = vpack.c.bf16 %v2717_v9, %v2713_v62  ;;  %v2720_v12 = vld [vmem:[#allocation8 + $0x48] sm:$0xff]  ;;  %v2758_v62 = vld [vmem:[#allocation8 + $0x178] sm:$0xff]  ;;  %v2751_v9 = vld [vmem:[#allocation8 + $0x140] sm:$0xff] }
 0x672   :  { %3767 = vtanh.f32 %v3630_v16  ;;  %v2724_v16 = vld [vmem:[#allocation8 + $0x68] sm:$0xff] }
 0x679   :  { %v3762_v22 = vpop.eup %3761 }
 0x67a   :  { %v3764_v19 = vpop.eup %3763  ;;  %v2349_v23 = vadd.f32 1.0, %v3762_v22  ;;  %v2722_v22 = vld [vmem:[#allocation8 + $0x58] sm:$0xff] }
 0x67b   :  { %v2355_v20 = vadd.f32 1.0, %v3764_v19  ;;  %v3766_v21 = vpop.eup %3765  ;;  %v2726_v19 = vld [vmem:[#allocation8 + $0x78] sm:$0xff] }
 0x67c   :  { %3769 = vrcp.f32 %v2349_v23  ;;  %v3768_v26 = vpop.eup %3767  ;;  %v2362_v39 = vadd.f32 1.0, %v3766_v21  ;;  %v2719_v23 = vld [vmem:[#allocation8 + $0x40] sm:$0xff]  ;;  %v3580_v21 = vpack.c.bf16 %v2726_v19, %v2722_v22  ;;  %v2753_v22 = vld [vmem:[#allocation8 + $0x150] sm:$0xff]  ;;  %v2760_v19 = vld [vmem:[#allocation8 + $0x188] sm:$0xff] }
 0x67d   :  { %3771 = vrcp.f32 %v2355_v20  ;;  %v2723_v20 = vld [vmem:[#allocation8 + $0x60] sm:$0xff] }
 0x67e   :  { %3773 = vrcp.f32 %v2362_v39  ;;  %v2728_v39 = vld [vmem:[#allocation8 + $0x88] sm:$0xff] }
 0x686   :  { %v3770_v34 = vpop.eup %3769 }
 0x687   :  { %v3772_v37 = vpop.eup %3771  ;;  %v2366_v38 = vmul.f32 %v3770_v34, %v3768_v26  ;;  %v3550_v26 = vpack.c.bf16 %v2723_v20, %v2719_v23  ;;  %v2721_v34 = vld [vmem:[#allocation8 + $0x50] sm:$0xff]  ;;  %v2764_v20 = vld [vmem:[#allocation8 + $0x1a8] sm:$0xff] }
 0x688   :  { %v2365_v42 = vmul.f32 %v3772_v37, %v4418_v3  ;;  %v3774_v46 = vpop.eup %3773  ;;  %v2718_v3 = vld [vmem:[#allocation8 + $0x38] sm:$0xff]  ;;  %v2725_v37 = vld [vmem:[#allocation8 + $0x70] sm:$0xff] }
 0x68a   :  { %v4460_v43 = vadd.f32 %v2366_v38, %v2365_v42  ;;  %v3582_v38 = vpack.c.bf16 %v2725_v37, %v2721_v34  ;;  %v2732_v42 = vld [vmem:[#allocation8 + $0xa8] sm:$0xff]  ;;  %v3568_v34 = vpack.c.bf16 %v2764_v20, %v2760_v19 }
 0x68c   :  { %3775 = vtanh.f32 %v4460_v43 }
 0x696   :  { %v3776_v15 = vpop.eup %3775 }
 0x697   :  { %v2369_v49 = vmul.f32 %v3776_v15, %v3774_v46  ;;  %v3552_v46 = vpack.c.bf16 %v2732_v42, %v2728_v39  ;;  %v2734_v15 = vld [vmem:[#allocation8 + $0xb8] sm:$0xff]  ;;  %v2763_v39 = vld [vmem:[#allocation8 + $0x1a0] sm:$0xff]  ;;  %v2761_v42 = vld [vmem:[#allocation8 + $0x190] sm:$0xff] }
 0x699   :  { %2435 = vmatmul.mubr.f32.vlgmr.msra.gmra.mrb[12].mxu0 %v2369_v49  ;;  %2506 = vmatmul.mubr.f32.vlgmr.msra.gmra.mrb[12].mxu1 %v2369_v49  ;;  %v2727_v49 = vld [vmem:[#allocation8 + $0x80] sm:$0xff] }
 0x69a   :  { %3483 = vmatpush1.bf16.msra.mxu0 %v4087_v28  ;;  %3515 = vmatpush1.bf16.msra.mxu1 %v4089_v29 }
 0x69b   :  { %3485 = vmatprep.subr.bf16.mxu0 %v4093_v32  ;;  %3517 = vmatprep.subr.bf16.mxu1 %v4095_v33 }
 0x69c   :  { %2604 = vmatprep.mubr.f32.mxu0 %v3911_v1  ;;  %2675 = vmatprep.mubr.f32.mxu1 %v3911_v1 }
 0x69e   :  { %3487 = vmatpush1.bf16.msra.mxu0 %v4103_v40  ;;  %3519 = vmatpush1.bf16.msra.mxu1 %v4105_v41 }
 0x69f   :  { %3489 = vmatprep.subr.bf16.mxu0 %v4109_v44  ;;  %3521 = vmatprep.subr.bf16.mxu1 %v4111_v45 }
 0x6a2   :  { %3491 = vmatpush1.bf16.msra.mxu0 %v4117_v52  ;;  %3523 = vmatpush1.bf16.msra.mxu1 %v4119_v53 }
 0x6a3   :  { %3493 = vmatprep.subr.bf16.mxu0 %v4123_v56  ;;  %3525 = vmatprep.subr.bf16.mxu1 %v4125_v57 }
 0x6a6   :  { %3495 = vmatpush1.bf16.msra.mxu0 %v4129_v0  ;;  %3527 = vmatpush1.bf16.msra.mxu1 %v4131_v2 }
 0x6a7   :  { %3497 = vmatprep.subr.bf16.mxu0 %v4135_v5  ;;  %3529 = vmatprep.subr.bf16.mxu1 %v4137_v6 }
 0x6aa   :  { %3499 = vmatpush1.bf16.msra.mxu0 %v4141_v13  ;;  %3531 = vmatpush1.bf16.msra.mxu1 %v4143_v14 }
 0x6ab   :  { %3501 = vmatprep.subr.bf16.mxu0 %v4147_v17  ;;  %3533 = vmatprep.subr.bf16.mxu1 %v4149_v18 }
 0x6ae   :  { %3503 = vmatpush1.bf16.msra.mxu0 %v4153_v27  ;;  %3535 = vmatpush1.bf16.msra.mxu1 %v4155_v30 }
 0x6af   :  { %3505 = vmatprep.subr.bf16.mxu0 %v4159_v35  ;;  %3537 = vmatprep.subr.bf16.mxu1 %v4161_v36 }
 0x6b2   :  { %3507 = vmatpush1.bf16.msra.mxu0 %v4165_v47  ;;  %3539 = vmatpush1.bf16.msra.mxu1 %v4167_v48 }
 0x6b3   :  { %3509 = vmatprep.subr.bf16.mxu0 %v4171_v50  ;;  %3541 = vmatprep.subr.bf16.mxu1 %v4173_v51  ;;  %v2712_v50 = vld [vmem:[#allocation8 + $0x8] sm:$0xff] }
 0x6b4   :  { %v2716_v51 = vld [vmem:[#allocation8 + $0x28] sm:$0xff] }
 0x6b6   :  { %3511 = vmatpush1.bf16.msra.mxu0 %v4177_v59  ;;  %3543 = vmatpush1.bf16.msra.mxu1 %v4179_v60  ;;  %v2714_v59 = vld [vmem:[#allocation8 + $0x18] sm:$0xff]  ;;  %v3544_v60 = vpack.c.bf16 %v2716_v51, %v2712_v50 }
 0x6b7   :  { %v3576_v58 = vpack.c.bf16 %v2718_v3, %v2714_v59  ;;  %v2745_v59 = vld [vmem:[#allocation8 + $0x110] sm:$0xff] }
 0x6b8   :  { %3545 = vmatprep.subr.bf16.mxu0 %v3544_v60  ;;  %v2749_v60 = vld [vmem:[#allocation8 + $0x130] sm:$0xff] }
 0x6b9   :  { %3577 = vmatprep.subr.bf16.mxu1 %v3576_v58  ;;  %v3594_v3 = vpack.c.bf16 %v2749_v60, %v2745_v59  ;;  %v2754_v58 = vld [vmem:[#allocation8 + $0x158] sm:$0xff] }
 0x76c   :  { %v2436_v28 = vpop.f32.mrb[12].mxu0  ;;  %v2507_v29 = vpop.f32.mrb[12].mxu1 }
 0x76d   :  { %v3632_v32 = vadd.f32 %v2436_v28, %v4231_v7  ;;  %v2438_v33 = vpop.f32.mrb[13].mxu0  ;;  %v2509_v40 = vpop.f32.mrb[13].mxu1  ;;  %v3634_v56 = vadd.f32 %v2507_v29, %v4247_v31  ;;  %v2731_v28 = vld [vmem:[#allocation8 + $0xa0] sm:$0xff] }
 0x76e   :  { %v3633_v41 = vadd.f32 %v2438_v33, %v4234_v8  ;;  %v3635_v52 = vadd.f32 %v2509_v40, %v4241_v24  ;;  %v2729_v33 = vld [vmem:[#allocation8 + $0x90] sm:$0xff] }
 0x76f   :  { %v3025_v44 = vmul.f32 -1.442695, %v3632_v32  ;;  %v3554_v32 = vpack.c.bf16 %v2731_v28, %v2727_v49  ;;  %v2733_v40 = vld [vmem:[#allocation8 + $0xb0] sm:$0xff]  ;;  %v2772_v49 = vld [vmem:[#allocation8 + $0x1e8] sm:$0xff] }
 0x770   :  { %v3026_v45 = vmul.f32 -1.442695, %v3633_v41  ;;  %v3027_v53 = vmul.f32 -1.442695, %v3635_v52  ;;  %v3586_v41 = vpack.c.bf16 %v2733_v40, %v2729_v33  ;;  %v2738_v52 = vld [vmem:[#allocation8 + $0xd8] sm:$0xff]  ;;  %v2767_v40 = vld [vmem:[#allocation8 + $0x1c0] sm:$0xff] }
 0x771   :  { %3777 = vpow2.f32 %v3025_v44  ;;  %v2736_v44 = vld [vmem:[#allocation8 + $0xc8] sm:$0xff]  ;;  %v2774_v33 = vld [vmem:[#allocation8 + $0x1f8] sm:$0xff] }
 0x772   :  { %3779 = vpow2.f32 %v3026_v45  ;;  %v2740_v45 = vld [vmem:[#allocation8 + $0xe8] sm:$0xff] }
 0x773   :  { %3781 = vpow2.f32 %v3027_v53  ;;  %v3556_v53 = vpack.c.bf16 %v2740_v45, %v2736_v44  ;;  %v2771_v44 = vld [vmem:[#allocation8 + $0x1e0] sm:$0xff]  ;;  %v2769_v45 = vld [vmem:[#allocation8 + $0x1d0] sm:$0xff] }
 0x774   :  { %3783 = vtanh.f32 %v3634_v56  ;;  %v2742_v56 = vld [vmem:[#allocation8 + $0xf8] sm:$0xff] }
 0x77b   :  { %v3778_v57 = vpop.eup %3777 }
 0x77c   :  { %v3780_v0 = vpop.eup %3779  ;;  %v2519_v2 = vadd.f32 1.0, %v3778_v57  ;;  %v2735_v57 = vld [vmem:[#allocation8 + $0xc0] sm:$0xff] }
 0x77d   :  { %v2525_v5 = vadd.f32 1.0, %v3780_v0  ;;  %v3782_v6 = vpop.eup %3781  ;;  %v2739_v0 = vld [vmem:[#allocation8 + $0xe0] sm:$0xff] }
 0x77e   :  { %3785 = vrcp.f32 %v2519_v2  ;;  %v3784_v13 = vpop.eup %3783  ;;  %v2532_v27 = vadd.f32 1.0, %v3782_v6  ;;  %v3588_v2 = vpack.c.bf16 %v2742_v56, %v2738_v52  ;;  %v2737_v6 = vld [vmem:[#allocation8 + $0xd0] sm:$0xff] }
 0x77f   :  { %3787 = vrcp.f32 %v2525_v5  ;;  %v3558_v5 = vpack.c.bf16 %v2739_v0, %v2735_v57  ;;  %v2773_v52 = vld [vmem:[#allocation8 + $0x1f0] sm:$0xff] }
 0x780   :  { %3789 = vrcp.f32 %v2532_v27  ;;  %v2746_v27 = vld [vmem:[#allocation8 + $0x118] sm:$0xff]  ;;  %v3606_v56 = vpack.c.bf16 %v2773_v52, %v2769_v45 }
 0x788   :  { %v3786_v14 = vpop.eup %3785 }
 0x789   :  { %v3788_v17 = vpop.eup %3787  ;;  %v2536_v18 = vmul.f32 %v3786_v14, %v3784_v13  ;;  %v2741_v13 = vld [vmem:[#allocation8 + $0xf0] sm:$0xff] }
 0x78a   :  { %v2535_v30 = vmul.f32 %v3788_v17, %v4460_v43  ;;  %v3790_v36 = vpop.eup %3789  ;;  %v2730_v43 = vld [vmem:[#allocation8 + $0x98] sm:$0xff]  ;;  %v3590_v14 = vpack.c.bf16 %v2741_v13, %v2737_v6  ;;  %v2744_v17 = vld [vmem:[#allocation8 + $0x108] sm:$0xff] }
 0x78b   :  { %v3584_v29 = vpack.c.bf16 %v2734_v15, %v2730_v43  ;;  %v2768_v15 = vld [vmem:[#allocation8 + $0x1c8] sm:$0xff] }
 0x78c   :  { %v4500_v35 = vadd.f32 %v2536_v18, %v2535_v30  ;;  %v2748_v18 = vld [vmem:[#allocation8 + $0x128] sm:$0xff] }
 0x78d   :  { %v3560_v30 = vpack.c.bf16 %v2748_v18, %v2744_v17 }
 0x78e   :  { %3791 = vtanh.f32 %v4500_v35 }
 0x798   :  { %v3792_v47 = vpop.eup %3791 }
 0x799   :  { %v2539_v48 = vmul.f32 %v3792_v47, %v3790_v36  ;;  %v2750_v36 = vld [vmem:[#allocation8 + $0x138] sm:$0xff]  ;;  %v2743_v47 = vld [vmem:[#allocation8 + $0x100] sm:$0xff] }
 0x79a   :  { %v3592_v50 = vpack.c.bf16 %v2750_v36, %v2746_v27 }
 0x79b   :  { %2605 = vmatmul.mubr.f32.vlgmr.msra.gmra.mrb[14].mxu0 %v2539_v48  ;;  %2676 = vmatmul.mubr.f32.vlgmr.msra.gmra.mrb[14].mxu1 %v2539_v48  ;;  %v2747_v48 = vld [vmem:[#allocation8 + $0x120] sm:$0xff] }
 0x79c   :  { %2861 = vmatprep.mubr.f32.mxu0 %v3911_v1  ;;  %2932 = vmatprep.mubr.f32.mxu1 %v3911_v1  ;;  %v3548_v1 = vpack.c.bf16 %v2724_v16, %v2720_v12  ;;  %v3562_v51 = vpack.c.bf16 %v2747_v48, %v2743_v47  ;;  %v3596_v12 = vpack.c.bf16 %v2758_v62, %v2754_v58  ;;  %v2775_v62 = vld [vmem:[%s4532_s5] sm:$0xf] }
 0x79d   :  { %3547 = vmatpush1.bf16.msra.mxu0 %v3546_v61  ;;  %3579 = vmatpush1.bf16.msra.mxu1 %v3578_v10  ;;  %v3564_v61 = vpack.c.bf16 %v2756_v55, %v2752_v54  ;;  %v2755_v10 = vld [vmem:[#allocation8 + $0x160] sm:$0xff] }
 0x79e   :  { %3549 = vmatprep.subr.bf16.mxu0 %v3548_v1  ;;  %3581 = vmatprep.subr.bf16.mxu1 %v3580_v21  ;;  %v3566_v16 = vpack.c.bf16 %v2755_v10, %v2751_v9  ;;  %v2757_v1 = vld [vmem:[#allocation8 + $0x170] sm:$0xff]  ;;  %v2762_v21 = vld [vmem:[#allocation8 + $0x198] sm:$0xff]  ;;  %v2780_v9 = vrot.slane %v2775_v62, %v4223_v63  ;;  %v2788_v10 = vrot.slane %v2775_v62, %v4243_v25 }
 0x79f   :  { %v3598_v23 = vpack.c.bf16 %v2757_v1, %v2753_v22 }
 0x7a1   :  { %3551 = vmatpush1.bf16.msra.mxu0 %v3550_v26  ;;  %3583 = vmatpush1.bf16.msra.mxu1 %v3582_v38  ;;  %v2766_v26 = vld [vmem:[#allocation8 + $0x1b8] sm:$0xff]  ;;  %v2759_v38 = vld [vmem:[#allocation8 + $0x180] sm:$0xff] }
 0x7a2   :  { %3553 = vmatprep.subr.bf16.mxu0 %v3552_v46  ;;  %3585 = vmatprep.subr.bf16.mxu1 %v3584_v29  ;;  %v3600_v37 = vpack.c.bf16 %v2766_v26, %v2762_v21  ;;  %v3570_v43 = vpack.c.bf16 %v2763_v39, %v2759_v38  ;;  %v2765_v46 = vld [vmem:[#allocation8 + $0x1b0] sm:$0xff]  ;;  %v3572_v29 = vpack.c.bf16 %v2772_v49, %v2768_v15 }
 0x7a3   :  { %v3602_v28 = vpack.c.bf16 %v2765_v46, %v2761_v42 }
 0x7a5   :  { %3555 = vmatpush1.bf16.msra.mxu0 %v3554_v32  ;;  %3587 = vmatpush1.bf16.msra.mxu1 %v3586_v41  ;;  %v2770_v32 = vld [vmem:[#allocation8 + $0x1d8] sm:$0xff] }
 0x7a6   :  { %3557 = vmatprep.subr.bf16.mxu0 %v3556_v53  ;;  %3589 = vmatprep.subr.bf16.mxu1 %v3588_v2  ;;  %v3604_v41 = vpack.c.bf16 %v2774_v33, %v2770_v32  ;;  %v3574_v53 = vpack.c.bf16 %v2771_v44, %v2767_v40  ;;  %v3031_v44 = vld [vmem:[#allocation2] ss:$0 sm:$0xff] }
 0x7a9   :  { %3559 = vmatpush1.bf16.msra.mxu0 %v3558_v5  ;;  %3591 = vmatpush1.bf16.msra.mxu1 %v3590_v14 }
 0x7aa   :  { %3561 = vmatprep.subr.bf16.mxu0 %v3560_v30  ;;  %3593 = vmatprep.subr.bf16.mxu1 %v3592_v50 }
 0x7ad   :  { %3563 = vmatpush1.bf16.msra.mxu0 %v3562_v51  ;;  %3595 = vmatpush1.bf16.msra.mxu1 %v3594_v3 }
 0x7ae   :  { %3565 = vmatprep.subr.bf16.mxu0 %v3564_v61  ;;  %3597 = vmatprep.subr.bf16.mxu1 %v3596_v12  ;;  %v2784_v12 = vrot.slane %v2775_v62, %v4228_v4 }
 0x7b1   :  { %3567 = vmatpush1.bf16.msra.mxu0 %v3566_v16  ;;  %3599 = vmatpush1.bf16.msra.mxu1 %v3598_v23  ;;  %v2792_v16 = vrot.slane %v2775_v62, %v4236_v11 }
 0x7b2   :  { %3569 = vmatprep.subr.bf16.mxu0 %v3568_v34  ;;  %3601 = vmatprep.subr.bf16.mxu1 %v3600_v37 }
 0x7b5   :  { %3571 = vmatpush1.bf16.msra.mxu0 %v3570_v43  ;;  %3603 = vmatpush1.bf16.msra.mxu1 %v3602_v28 }
 0x7b6   :  { %3573 = vmatprep.subr.bf16.mxu0 %v3572_v29  ;;  %3605 = vmatprep.subr.bf16.mxu1 %v3604_v41 }
 0x7b9   :  { %3575 = vmatpush1.bf16.msra.mxu0 %v3574_v53  ;;  %3607 = vmatpush1.bf16.msra.mxu1 %v3606_v56 }
 0x86e   :  { %v2606_v57 = vpop.f32.mrb[14].mxu0  ;;  %v2677_v0 = vpop.f32.mrb[14].mxu1 }
 0x86f   :  { %v3636_v2 = vadd.f32 %v2606_v57, %v4231_v7  ;;  %v2608_v5 = vpop.f32.mrb[15].mxu0  ;;  %v2679_v6 = vpop.f32.mrb[15].mxu1  ;;  %v3638_v30 = vadd.f32 %v2677_v0, %v4247_v31 }
 0x870   :  { %v3637_v13 = vadd.f32 %v2608_v5, %v4234_v8  ;;  %v3639_v18 = vadd.f32 %v2679_v6, %v4241_v24 }
 0x871   :  { %v3028_v14 = vmul.f32 -1.442695, %v3636_v2 }
 0x872   :  { %v3029_v17 = vmul.f32 -1.442695, %v3637_v13  ;;  %v3030_v27 = vmul.f32 -1.442695, %v3639_v18 }
 0x873   :  { %3793 = vpow2.f32 %v3028_v14 }
 0x874   :  { %3795 = vpow2.f32 %v3029_v17 }
 0x875   :  { %3797 = vpow2.f32 %v3030_v27 }
 0x876   :  { %3799 = vtanh.f32 %v3638_v30 }
 0x87d   :  { %v3794_v36 = vpop.eup %3793 }
 0x87e   :  { %v3796_v47 = vpop.eup %3795  ;;  %v2689_v48 = vadd.f32 1.0, %v3794_v36 }
 0x87f   :  { %v2695_v50 = vadd.f32 1.0, %v3796_v47  ;;  %v3798_v7 = vpop.eup %3797 }
 0x880   :  { %3801 = vrcp.f32 %v2689_v48  ;;  %v3800_v51 = vpop.eup %3799  ;;  %v2702_v3 = vadd.f32 1.0, %v3798_v7 }
 0x881   :  { %3803 = vrcp.f32 %v2695_v50 }
 0x882   :  { %3805 = vrcp.f32 %v2702_v3 }
 0x88a   :  { %v3802_v8 = vpop.eup %3801 }
 0x88b   :  { %v3804_v59 = vpop.eup %3803  ;;  %v2706_v60 = vmul.f32 %v3802_v8, %v3800_v51 }
 0x88c   :  { %v2705_v54 = vmul.f32 %v3804_v59, %v4500_v35  ;;  %v3806_v31 = vpop.eup %3805  ;;  %v2943_v35 = vld [vmem:[%s4533_s6] sm:$0xf] }
 0x88d   :  { %v2948_v23 = vrot.slane %v2943_v35, %v4223_v63  ;;  %v2952_v37 = vrot.slane %v2943_v35, %v4228_v4  ;;  %v2956_v43 = vrot.slane %v2943_v35, %v4243_v25  ;;  %v2960_v29 = vrot.slane %v2943_v35, %v4236_v11 }
 0x88e   :  { %v2707_v24 = vadd.f32 %v2706_v60, %v2705_v54 }
 0x890   :  { %3807 = vtanh.f32 %v2707_v24 }
 0x89a   :  { %v3808_v55 = vpop.eup %3807 }
 0x89b   :  { %v2709_v58 = vmul.f32 %v3808_v55, %v3806_v31 }
 0x89d   :  { %v2710_v61 = vmax.f32 %v2709_v58, 0.0 }
 0x89f   :  { %2862 = vmatmul.mubr.f32.vlgmr.msra.gmra.mrb[16].mxu0 %v2710_v61  ;;  %2933 = vmatmul.mubr.f32.vlgmr.msra.gmra.mrb[16].mxu1 %v2710_v61 }
 0x972   :  { %v2863_v22 = vpop.f32.mrb[16].mxu0  ;;  %v2934_v1 = vpop.f32.mrb[16].mxu1 }
 0x973   :  { %v2864_v19 = vadd.f32 %v2863_v22, %v2780_v9  ;;  %v2935_v20 = vadd.f32 %v2934_v1, %v2788_v10  ;;  %v2865_v21 = vpop.f32.mrb[17].mxu0  ;;  %v2936_v26 = vpop.f32.mrb[17].mxu1 }
 0x974   :  { %v2866_v34 = vadd.f32 %v2865_v21, %v2784_v12  ;;  %v2937_v38 = vadd.f32 %v2936_v26, %v2792_v16 }
 0x975   :  { %v2939_v39 = vmax.f32 %v2864_v19, 0.0  ;;  %v2941_v42 = vmax.f32 %v2935_v20, 0.0 }
 0x976   :  { %v2940_v46 = vmax.f32 %v2866_v34, 0.0  ;;  %v2942_v28 = vmax.f32 %v2937_v38, 0.0 }
 0x977   :  { %v2965_v15 = vmul.f32 %v2948_v23, %v2939_v39  ;;  %v2967_v32 = vmul.f32 %v2956_v43, %v2941_v42 }
 0x978   :  { %v2966_v49 = vmul.f32 %v2952_v37, %v2940_v46  ;;  %v2968_v63 = vmul.f32 %v2960_v29, %v2942_v28 }
 0x97a   :  { %v2969_v33 = vadd.f32 %v2966_v49, %v2965_v15 }
 0x97c   :  { %v2970_v40 = vadd.f32 %v2969_v33, %v2967_v32 }
 0x97e   :  { %v2971_v41 = vadd.f32 %v2970_v40, %v2968_v63 }
 0x980   :  { %2972 = vadd.xlane.f32.xlu0 %v2971_v41 }
 0xa0d   :  { %v2973_v45 = vpop.xlane.xlu0 %2972 }
 0xa0e   :  { %v2981_v4 = vadd.f32 %v3031_v44, %v2973_v45 }
 0xa10   :  { %2983 = vst.msk [vmem:[%s4535_s8] sm:$0xff] %vm2982_vm1, %v2981_v4 }
 0xa11   :  { %2988 = vsyncpa [#allocation4], 1 }
 0xa12   :  { %2989 = vsyncpa [#allocation6], 1 }
 0xa13   :  { %2990 = vsyncpa [#allocation9], 1 }

</bundles_post_ra>
